<compile_context>
chip_gen: v5e
topology: v5e:2x2
jax: 0.10.0
libtpu: 0.0.40
codegen_flags: <defaults>
</compile_context>

<pallas_src>
import jax
import jax.numpy as jnp
from jax.experimental import pallas as pl
from jax.experimental.pallas import tpu as pltpu


def _se_conv_bn_kernel(x_ref, scale_ref, w_ref, gamma_ref, beta_ref, o_ref):
    """sigmoid(scale)*x -> 1x1 conv (matmul) -> batchnorm (batch statistics).

    x_ref:     (Cin, R)    R = N*H*W  (N == 1), native NCHW layout flattened
    scale_ref: (1, Cin)    per-input-channel gate (from the (1,Cin,1,1) tensor)
    w_ref:     (Cout, Cin) 1x1 conv weight
    gamma_ref: (Cout, 1)   BN weight
    beta_ref:  (Cout, 1)   BN bias
    o_ref:     (Cout, R)
    """
    # Fold the sigmoid gate into the weight: conv(x * g) == (W * g) @ x
    gate = jax.nn.sigmoid(scale_ref[...])                    # (1, Cin)
    w_gated = w_ref[...] * gate                              # (Cout, Cin)

    # 1x1 conv == matmul on the MXU, contracting over Cin.
    y = jnp.dot(w_gated, x_ref[...],
                preferred_element_type=jnp.float32)          # (Cout, R)

    # BatchNorm2d (training mode): biased batch stats per output channel,
    # computed in one reduction pass (E[y^2] - mean^2).
    eps = 1e-3
    inv_r = 1.0 / y.shape[-1]
    mean = jnp.sum(y, axis=-1, keepdims=True) * inv_r        # (Cout, 1)
    mean_sq = jnp.sum(y * y, axis=-1, keepdims=True) * inv_r
    var = mean_sq - mean * mean
    inv_std = jax.lax.rsqrt(var + eps)
    o_ref[...] = (gamma_ref[...] * (y - mean) * inv_std
                  + beta_ref[...]).astype(o_ref.dtype)


def se_conv_bn(x_nchw, scale_nc11, w_oihw, gamma, beta):
    """x_nchw: (1, Cin, H, W); scale_nc11: (1, Cin, 1, 1); w_oihw: (Cout, Cin, 1, 1)."""
    N, Cin, H, W = x_nchw.shape
    Cout = w_oihw.shape[0]
    assert N == 1, "kernel assumes batch size 1 (as in the reference module)"
    R = H * W

    # Pure reshapes -- no transposes / extra HBM passes.
    x = x_nchw.reshape(Cin, R)                # (Cin, R)
    scale = scale_nc11.reshape(1, Cin)        # (1, Cin)
    w = w_oihw.reshape(Cout, Cin)             # (Cout, Cin)
    gamma2 = gamma.reshape(Cout, 1)
    beta2 = beta.reshape(Cout, 1)

    vmem = pl.BlockSpec(memory_space=pltpu.MemorySpace.VMEM)
    out = pl.pallas_call(
        _se_conv_bn_kernel,
        out_shape=jax.ShapeDtypeStruct((Cout, R), x_nchw.dtype),
        in_specs=[vmem, vmem, vmem, vmem, vmem],
        out_specs=vmem,
    )(x, scale, w, gamma2, beta2)

    # (Cout, R) -> (1, Cout, H, W), again a pure reshape.
    return out.reshape(1, Cout, H, W)


if __name__ == "__main__":
    key = jax.random.PRNGKey(0)
    k1, k2, k3 = jax.random.split(key, 3)

    # Shapes implied by the module: x71 (1,256,14,14), x75 (1,256,1,1)
    N, Cin, Cout, H, W = 1, 256, 128, 14, 14

    x71 = jax.random.normal(k1, (N, Cin, H, W), dtype=jnp.float32)
    x75 = jax.random.normal(k2, (1, Cin, 1, 1), dtype=jnp.float32)

    # Conv2d(256, 128, 1x1, bias=False) weight, deterministic init
    w = jax.random.normal(k3, (Cout, Cin, 1, 1), dtype=jnp.float32) * 0.05
    # BatchNorm2d(128) affine params at PyTorch default init (gamma=1, beta=0)
    gamma = jnp.ones((Cout,), dtype=jnp.float32)
    beta = jnp.zeros((Cout,), dtype=jnp.float32)

    out = se_conv_bn(x71, x75, w, gamma, beta)
    jax.block_until_ready(out)
    assert out.shape == (N, Cout, H, W)

    # TODO(synk): BatchNorm2d running_mean/running_var updates (training-mode
    # side effects) are not produced; only the normalized forward output is.
    print("KERNEL_OK")
</pallas_src>

<mosaic_0001>
module attributes {stable_mosaic.version = 11 : i64} {
  func.func @_se_conv_bn_kernel(%arg0: memref<256x196xf32, #tpu.memory_space<vmem>>, %arg1: memref<1x256xf32, #tpu.memory_space<vmem>>, %arg2: memref<128x256xf32, #tpu.memory_space<vmem>>, %arg3: memref<128x1xf32, #tpu.memory_space<vmem>>, %arg4: memref<128x1xf32, #tpu.memory_space<vmem>>, %arg5: memref<128x196xf32, #tpu.memory_space<vmem>>) attributes {dimension_semantics = [], scalar_prefetch = 0 : i64, scratch_operands = 0 : i64, tpu.core_type = #tpu.core_type<tc>} {
    %c0 = arith.constant 0 : index
    %c0_0 = arith.constant 0 : index
    %0 = vector.load %arg1[%c0, %c0_0] : memref<1x256xf32, #tpu.memory_space<vmem>>, vector<1x256xf32>
    %1 = arith.negf %0 : vector<1x256xf32>
    %2 = math.exp %1 : vector<1x256xf32>
    %cst = arith.constant 1.000000e+00 : f32
    %3 = vector.broadcast %cst : f32 to vector<1x256xf32>
    %4 = arith.addf %3, %2 : vector<1x256xf32>
    %5 = arith.divf %3, %4 : vector<1x256xf32>
    %c0_1 = arith.constant 0 : index
    %c0_2 = arith.constant 0 : index
    %6 = vector.load %arg2[%c0_1, %c0_2] : memref<128x256xf32, #tpu.memory_space<vmem>>, vector<128x256xf32>
    %7 = vector.broadcast %5 : vector<1x256xf32> to vector<128x256xf32>
    %8 = arith.mulf %6, %7 : vector<128x256xf32>
    %c0_3 = arith.constant 0 : index
    %c0_4 = arith.constant 0 : index
    %9 = vector.load %arg0[%c0_3, %c0_4] : memref<256x196xf32, #tpu.memory_space<vmem>>, vector<256x196xf32>
    %cst_5 = arith.constant dense<0.000000e+00> : vector<128x196xf32>
    %10 = tpu.matmul %8, %9, %cst_5 {dimension_numbers = #tpu.dot_dimension_numbers<[1], [0], [0], [1], [0, 0, 1, 1], [], []>} : vector<128x256xf32>, vector<256x196xf32>, vector<128x196xf32> -> vector<128x196xf32>
    %cst_6 = arith.constant dense<0.000000e+00> : vector<128xf32>
    %11 = vector.multi_reduction <add>, %10, %cst_6 [1] : vector<128x196xf32> to vector<128xf32>
    %12 = vector.shape_cast %11 : vector<128xf32> to vector<128x1xf32>
    %cst_7 = arith.constant 0.00510204071 : f32
    %13 = vector.broadcast %cst_7 : f32 to vector<128x1xf32>
    %14 = arith.mulf %12, %13 : vector<128x1xf32>
    %15 = arith.mulf %10, %10 : vector<128x196xf32>
    %cst_8 = arith.constant dense<0.000000e+00> : vector<128xf32>
    %16 = vector.multi_reduction <add>, %15, %cst_8 [1] : vector<128x196xf32> to vector<128xf32>
    %17 = vector.shape_cast %16 : vector<128xf32> to vector<128x1xf32>
    %cst_9 = arith.constant 0.00510204071 : f32
    %18 = vector.broadcast %cst_9 : f32 to vector<128x1xf32>
    %19 = arith.mulf %17, %18 : vector<128x1xf32>
    %20 = arith.mulf %14, %14 : vector<128x1xf32>
    %21 = arith.subf %19, %20 : vector<128x1xf32>
    %cst_10 = arith.constant 1.000000e-03 : f32
    %22 = vector.broadcast %cst_10 : f32 to vector<128x1xf32>
    %23 = arith.addf %21, %22 : vector<128x1xf32>
    %24 = math.rsqrt %23 : vector<128x1xf32>
    %c0_11 = arith.constant 0 : index
    %c0_12 = arith.constant 0 : index
    %25 = vector.load %arg3[%c0_11, %c0_12] : memref<128x1xf32, #tpu.memory_space<vmem>>, vector<128x1xf32>
    %26 = vector.broadcast %14 : vector<128x1xf32> to vector<128x196xf32>
    %27 = arith.subf %10, %26 : vector<128x196xf32>
    %28 = vector.broadcast %25 : vector<128x1xf32> to vector<128x196xf32>
    %29 = arith.mulf %28, %27 : vector<128x196xf32>
    %30 = vector.broadcast %24 : vector<128x1xf32> to vector<128x196xf32>
    %31 = arith.mulf %29, %30 : vector<128x196xf32>
    %c0_13 = arith.constant 0 : index
    %c0_14 = arith.constant 0 : index
    %32 = vector.load %arg4[%c0_13, %c0_14] : memref<128x1xf32, #tpu.memory_space<vmem>>, vector<128x1xf32>
    %33 = vector.broadcast %32 : vector<128x1xf32> to vector<128x196xf32>
    %34 = arith.addf %31, %33 : vector<128x196xf32>
    %c0_15 = arith.constant 0 : index
    %c0_16 = arith.constant 0 : index
    %35 = vector.load %arg5[%c0_15, %c0_16] : memref<128x196xf32, #tpu.memory_space<vmem>>, vector<128x196xf32>
    tpu.vector_store %arg5[%c0_15, %c0_16], %34 {strides = array<i32>} : memref<128x196xf32, #tpu.memory_space<vmem>>, vector<128x196xf32>,
    return
  }
}

</mosaic_0001>

<bundles_post_ra>
// kernel: tpu_custom_call.1
= control target key start
LH: loop header
LB: loop body
LE: loop exit
PB: predicated region body
PF: predicated region fallthrough
CT: control target
= control target key end

     0   :  { %v1231_v3 = vmov 0   ;;  %vm433_vm4 = vcmask 556032   ;;  %s2251_s0 = inlined_call_operand.vmem [shape: f32[256,196], index: 0, kind: input, shape index: {}]   ;;  %s2252_s3 = inlined_call_operand.vmem [shape: f32[128,1], index: 3, kind: input, shape index: {}]   ;;  %s2253_s1 = inlined_call_operand.vmem [shape: f32[1,256], index: 1, kind: input, shape index: {}]   ;;  %s2254_s2 = inlined_call_operand.vmem [shape: f32[128,256], index: 2, kind: input, shape index: {}]   ;;  %s2255_s4 = inlined_call_operand.vmem [shape: f32[128,1], index: 4, kind: input, shape index: {}]   ;;  %s2256_s5 = inlined_call_operand.vmem [shape: f32[128,196], index: 5, kind: output, shape index: {}]  }
   0x1   :  { %v140_v0 = vld [vmem:[%s2251_s0 + $0xf8] sm:$0xff]  ;;  %v138_v2 = vld [vmem:[%s2251_s0 + $0xe8] sm:$0xff]  ;;  %1192 = vset.pattern.permute.xlu2 %v1231_v3  ;;  %1194 = vset.pattern.permute.xlu1 %v1231_v3  ;;  %v139_v7 = vld [vmem:[%s2251_s0 + $0xf0] sm:$0xff] }
   0x2   :  { %v172_v1 = vld [vmem:[%s2251_s0 + $0x1f8] sm:$0xff]  ;;  %303 = vmatpush.msra.mxu2 %v140_v0  ;;  %v170_v4 = vld [vmem:[%s2251_s0 + $0x1e8] sm:$0xff]  ;;  %1193 = vset.pattern.permute.xlu0 %v1231_v3  ;;  %v171_v9 = vld [vmem:[%s2251_s0 + $0x1f0] sm:$0xff] }
   0x3   :  { %368 = vmatpush.msra.mxu3 %v172_v1  ;;  %v136_v5 = vld [vmem:[%s2251_s0 + $0xd8] sm:$0xff]  ;;  %v134_v8 = vld [vmem:[%s2251_s0 + $0xc8] sm:$0xff]  ;;  %173 = vmatpush.msra.mxu0 %v139_v7  ;;  %v137_v11 = vld [vmem:[%s2251_s0 + $0xe0] sm:$0xff] }
   0x4   :  { %v168_v6 = vld [vmem:[%s2251_s0 + $0x1d8] sm:$0xff]  ;;  %304 = vmatpush.msra.mxu2 %v138_v2  ;;  %v166_v10 = vld [vmem:[%s2251_s0 + $0x1c8] sm:$0xff]  ;;  %238 = vmatpush.msra.mxu1 %v171_v9  ;;  %v169_v12 = vld [vmem:[%s2251_s0 + $0x1e0] sm:$0xff] }
   0x5   :  { %369 = vmatpush.msra.mxu3 %v170_v4  ;;  %v135_v13 = vld [vmem:[%s2251_s0 + $0xd0] sm:$0xff]  ;;  %v132_v15 = vld [vmem:[%s2251_s0 + $0xb8] sm:$0xff]  ;;  %174 = vmatpush.msra.mxu0 %v137_v11  ;;  %v133_v17 = vld [vmem:[%s2251_s0 + $0xc0] sm:$0xff] }
   0x6   :  { %305 = vmatpush.msra.mxu2 %v136_v5  ;;  %v167_v14 = vld [vmem:[%s2251_s0 + $0x1d0] sm:$0xff]  ;;  %v164_v16 = vld [vmem:[%s2251_s0 + $0x1b8] sm:$0xff]  ;;  %239 = vmatpush.msra.mxu1 %v169_v12  ;;  %v165_v18 = vld [vmem:[%s2251_s0 + $0x1c0] sm:$0xff] }
   0x7   :  { %370 = vmatpush.msra.mxu3 %v168_v6  ;;  %v130_v19 = vld [vmem:[%s2251_s0 + $0xa8] sm:$0xff]  ;;  %175 = vmatpush.msra.mxu0 %v135_v13  ;;  %v131_v21 = vld [vmem:[%s2251_s0 + $0xb0] sm:$0xff]  ;;  %v128_v23 = vld [vmem:[%s2251_s0 + $0x98] sm:$0xff] }
   0x8   :  { %306 = vmatpush.msra.mxu2 %v134_v8  ;;  %v162_v20 = vld [vmem:[%s2251_s0 + $0x1a8] sm:$0xff]  ;;  %240 = vmatpush.msra.mxu1 %v167_v14  ;;  %v163_v22 = vld [vmem:[%s2251_s0 + $0x1b0] sm:$0xff]  ;;  %v160_v24 = vld [vmem:[%s2251_s0 + $0x198] sm:$0xff] }
   0x9   :  { %371 = vmatpush.msra.mxu3 %v166_v10  ;;  %176 = vmatpush.msra.mxu0 %v133_v17  ;;  %v834_v25 = vld [vmem:[%s2252_s3] sm:$0xff]  ;;  %v126_v27 = vld [vmem:[%s2251_s0 + $0x88] sm:$0xff]  ;;  %v127_v30 = vld [vmem:[%s2251_s0 + $0x90] sm:$0xff] }
   0xa   :  { %307 = vmatpush.msra.mxu2 %v132_v15  ;;  %241 = vmatpush.msra.mxu1 %v165_v18  ;;  %v129_v26 = vld [vmem:[%s2251_s0 + $0xa0] sm:$0xff]  ;;  %v158_v28 = vld [vmem:[%s2251_s0 + $0x188] sm:$0xff]  ;;  %v124_v31 = vld [vmem:[%s2251_s0 + $0x78] sm:$0xff] }
   0xb   :  { %372 = vmatpush.msra.mxu3 %v164_v16  ;;  %177 = vmatpush.msra.mxu0 %v131_v21  ;;  %v161_v29 = vld [vmem:[%s2251_s0 + $0x1a0] sm:$0xff]  ;;  %v156_v32 = vld [vmem:[%s2251_s0 + $0x178] sm:$0xff]  ;;  %v159_v33 = vld [vmem:[%s2251_s0 + $0x190] sm:$0xff] }
   0xc   :  { %308 = vmatpush.msra.mxu2 %v130_v19  ;;  %242 = vmatpush.msra.mxu1 %v163_v22  ;;  %v125_v34 = vld [vmem:[%s2251_s0 + $0x80] sm:$0xff]  ;;  %v122_v35 = vld [vmem:[%s2251_s0 + $0x68] sm:$0xff]  ;;  %v123_v38 = vld [vmem:[%s2251_s0 + $0x70] sm:$0xff] }
   0xd   :  { %373 = vmatpush.msra.mxu3 %v162_v20  ;;  %884 = vperm.xlu2 %1192, %v834_v25   ;;  %v154_v36 = vld [vmem:[%s2251_s0 + $0x168] sm:$0xff]  ;;  %v157_v37 = vld [vmem:[%s2251_s0 + $0x180] sm:$0xff]  ;;  %v120_v39 = vld [vmem:[%s2251_s0 + $0x58] sm:$0xff] }
   0xe   :  { %309 = vmatpush.msra.mxu2 %v128_v23  ;;  %178 = vmatpush.msra.mxu0 %v129_v26  ;;  %v152_v40 = vld [vmem:[%s2251_s0 + $0x158] sm:$0xff]  ;;  %v155_v41 = vld [vmem:[%s2251_s0 + $0x170] sm:$0xff]  ;;  %v118_v43 = vld [vmem:[%s2251_s0 + $0x48] sm:$0xff] }
   0xf   :  { %374 = vmatpush.msra.mxu3 %v160_v24  ;;  %243 = vmatpush.msra.mxu1 %v161_v29  ;;  %v837_v42 = vld [vmem:[%s2252_s3 + $0x18] sm:$0xff]  ;;  %v150_v44 = vld [vmem:[%s2251_s0 + $0x148] sm:$0xff]  ;;  %v20_v45 = vld [vmem:[%s2253_s1] sm:$0x3] }
  0x10   :  { %310 = vmatpush.msra.mxu2 %v126_v27  ;;  %179 = vmatpush.msra.mxu0 %v127_v30  ;;  %v121_v46 = vld [vmem:[%s2251_s0 + $0x60] sm:$0xff]  ;;  %v1190_v48 = vmul.f32 -1.442695, %v20_v45  ;;  %v116_v49 = vld [vmem:[%s2251_s0 + $0x38] sm:$0xff]  ;;  %v836_v51 = vld [vmem:[%s2252_s3 + $0x10] sm:$0xff] }
  0x11   :  { %375 = vmatpush.msra.mxu3 %v158_v28  ;;  %244 = vmatpush.msra.mxu1 %v159_v33  ;;  %v153_v47 = vld [vmem:[%s2251_s0 + $0x160] sm:$0xff]  ;;  %v148_v50 = vld [vmem:[%s2251_s0 + $0x138] sm:$0xff]  ;;  %v119_v52 = vld [vmem:[%s2251_s0 + $0x50] sm:$0xff] }
  0x12   :  { %311 = vmatpush.msra.mxu2 %v124_v31  ;;  %180 = vmatpush.msra.mxu0 %v125_v34  ;;  %1195 = vpow2.f32 %v1190_v48  ;;  %v114_v53 = vld [vmem:[%s2251_s0 + $0x28] sm:$0xff]  ;;  %v151_v55 = vld [vmem:[%s2251_s0 + $0x150] sm:$0xff]  ;;  %v117_v56 = vld [vmem:[%s2251_s0 + $0x40] sm:$0xff] }
  0x13   :  { %376 = vmatpush.msra.mxu3 %v156_v32  ;;  %245 = vmatpush.msra.mxu1 %v157_v37  ;;  %v146_v54 = vld [vmem:[%s2251_s0 + $0x128] sm:$0xff]  ;;  %v112_v57 = vld [vmem:[%s2251_s0 + $0x18] sm:$0xff]  ;;  %v149_v59 = vld [vmem:[%s2251_s0 + $0x140] sm:$0xff] }
  0x14   :  { %312 = vmatpush.msra.mxu2 %v122_v35  ;;  %181 = vmatpush.msra.mxu0 %v123_v38  ;;  %v144_v58 = vld [vmem:[%s2251_s0 + $0x118] sm:$0xff]  ;;  %v115_v60 = vld [vmem:[%s2251_s0 + $0x30] sm:$0xff]  ;;  %v110_v61 = vld [vmem:[%s2251_s0 + $0x8] sm:$0xff] }
  0x15   :  { %377 = vmatpush.msra.mxu3 %v154_v36  ;;  %246 = vmatpush.msra.mxu1 %v155_v41  ;;  %v142_v62 = vld [vmem:[%s2251_s0 + $0x108] sm:$0xff]  ;;  %v147_v0 = vld [vmem:[%s2251_s0 + $0x130] sm:$0xff]  ;;  %v838_v1 = vld [vmem:[%s2252_s3 + $0x20] sm:$0xff] }
  0x16   :  { %313 = vmatpush.msra.mxu2 %v120_v39  ;;  %899 = vperm.xlu2 %1192, %v837_v42   ;;  %v113_v3 = vld [vmem:[%s2251_s0 + $0x20] sm:$0xff]  ;;  %v839_v5 = vld [vmem:[%s2252_s3 + $0x28] sm:$0xff]  ;;  %v111_v6 = vld [vmem:[%s2251_s0 + $0x10] sm:$0xff] }
  0x17   :  { %378 = vmatpush.msra.mxu3 %v152_v40  ;;  %182 = vmatpush.msra.mxu0 %v121_v46  ;;  %v145_v4 = vld [vmem:[%s2251_s0 + $0x120] sm:$0xff]  ;;  %v143_v7 = vld [vmem:[%s2251_s0 + $0x110] sm:$0xff]  ;;  %v841_v13 = vld [vmem:[%s2252_s3 + $0x38] sm:$0xff] }
  0x18   :  { %314 = vmatpush.msra.mxu2 %v118_v43  ;;  %247 = vmatpush.msra.mxu1 %v153_v47  ;;  %v1196_v63 = vpop.eup %1195  ;;  %v109_v8 = vld [vmem:[%s2251_s0] sm:$0xff]  ;;  %v840_v10 = vld [vmem:[%s2252_s3 + $0x30] sm:$0xff]  ;;  %v843_v20 = vld [vmem:[%s2252_s3 + $0x48] sm:$0xff] }
  0x19   :  { %379 = vmatpush.msra.mxu3 %v150_v44  ;;  %894 = vperm.xlu1 %1194, %v836_v51   ;;  %v24_v2 = vadd.f32 1.0, %v1196_v63  ;;  %v141_v9 = vld [vmem:[%s2251_s0 + $0x100] sm:$0xff]  ;;  %v835_v21 = vld [vmem:[%s2252_s3 + $0x8] sm:$0xff]  ;;  %v844_v23 = vld [vmem:[%s2252_s3 + $0x50] sm:$0xff] }
  0x1a   :  { %315 = vmatpush.msra.mxu2 %v116_v49  ;;  %183 = vmatpush.msra.mxu0 %v119_v52  ;;  %v40_v25 = vld [vmem:[%s2254_s2] sm:$0xff]  ;;  %v41_v26 = vld [vmem:[%s2254_s2 + $0x8] sm:$0xff]  ;;  %v42_v33 = vld [vmem:[%s2254_s2 + $0x10] sm:$0xff] }
  0x1b   :  { %380 = vmatpush.msra.mxu3 %v148_v50  ;;  %248 = vmatpush.msra.mxu1 %v151_v55  ;;  %1197 = vrcp.f32 %v24_v2  ;;  %v36_v14 = vand.u32 2147483648, %v24_v2  ;;  %vm30_vm0 = vweird.f32 %v24_v2  ;;  %v34_v16 = vand.u32 2147483647, %v24_v2  ;;  %v846_v31 = vld [vmem:[%s2252_s3 + $0x60] sm:$0xff]  ;;  %v43_v34 = vld [vmem:[%s2254_s2 + $0x18] sm:$0xff]  ;;  %v847_v35 = vld [vmem:[%s2252_s3 + $0x68] sm:$0xff] }
  0x1c   :  { %316 = vmatpush.msra.mxu2 %v114_v53  ;;  %184 = vmatpush.msra.mxu0 %v117_v56  ;;  %v842_v32 = vld [vmem:[%s2252_s3 + $0x40] sm:$0xff]  ;;  %v849_v38 = vld [vmem:[%s2252_s3 + $0x78] sm:$0xff]  ;;  %v45_v41 = vld [vmem:[%s2254_s2 + $0x28] sm:$0xff] }
  0x1d   :  { %381 = vmatpush.msra.mxu3 %v146_v54  ;;  %249 = vmatpush.msra.mxu1 %v149_v59  ;;  %v37_v18 = vor.u32 1.1754944e-38, %v36_v14  ;;  %vm35_vm3 = vcmp.eq.f32.partialorder %v34_v16, 8.507059e+37  ;;  %v845_v39 = vld [vmem:[%s2252_s3 + $0x58] sm:$0xff]  ;;  %v44_v40 = vld [vmem:[%s2254_s2 + $0x20] sm:$0xff]  ;;  %v1028_v45 = vld [vmem:[%s2255_s4 + $0x10] sm:$0xff] }
  0x1e   :  { %317 = vmatpush.msra.mxu2 %v112_v57  ;;  %185 = vmatpush.msra.mxu0 %v115_v60  ;;  %v1026_v42 = vld [vmem:[%s2255_s4] sm:$0xff]  ;;  %v848_v46 = vld [vmem:[%s2252_s3 + $0x70] sm:$0xff]  ;;  %v47_v48 = vld [vmem:[%s2254_s2 + $0x38] sm:$0xff] }
  0x1f   :  { %382 = vmatpush.msra.mxu3 %v144_v58  ;;  %250 = vmatpush.msra.mxu1 %v147_v0  ;;  %v46_v47 = vld [vmem:[%s2254_s2 + $0x30] sm:$0xff]  ;;  %v1029_v49 = vld [vmem:[%s2255_s4 + $0x18] sm:$0xff]  ;;  %v1031_v52 = vld [vmem:[%s2255_s4 + $0x28] sm:$0xff] }
  0x20   :  { %318 = vmatpush.msra.mxu2 %v110_v61  ;;  %904 = vperm.xlu2 %1192, %v838_v1   ;;  %v1027_v53 = vld [vmem:[%s2255_s4 + $0x8] sm:$0xff]  ;;  %v48_v54 = vld [vmem:[%s2254_s2 + $0x40] sm:$0xff]  ;;  %v1032_v56 = vld [vmem:[%s2255_s4 + $0x30] sm:$0xff] }
  0x21   :  { %383 = vmatpush.msra.mxu3 %v142_v62  ;;  %186 = vmatpush.msra.mxu0 %v113_v3  ;;  %v1198_v11 = vpop.eup %1197  ;;  %v49_v55 = vld [vmem:[%s2254_s2 + $0x48] sm:$0xff]  ;;  %v1034_v59 = vld [vmem:[%s2255_s4 + $0x40] sm:$0xff]  ;;  %v50_v61 = vld [vmem:[%s2254_s2 + $0x50] sm:$0xff] }
  0x22   :  { %251 = vmatpush.msra.mxu1 %v145_v4  ;;  %909 = vperm.xlu1 %1194, %v839_v5   ;;  %v26_v12 = vmul.f32 %v1198_v11, %v24_v2  ;;  %vm31_vm1 = vweird.f32 %v1198_v11  ;;  %v1030_v60 = vld [vmem:[%s2255_s4 + $0x20] sm:$0xff]  ;;  %v51_v62 = vld [vmem:[%s2254_s2 + $0x58] sm:$0xff]  ;;  %v1035_v63 = vld [vmem:[%s2255_s4 + $0x48] sm:$0xff] }
  0x23   :  { %187 = vmatpush.msra.mxu0 %v111_v6  ;;  %vm32_vm2 = vmor %vm30_vm0, %vm31_vm1  ;;  %889 = vperm.xlu0 %1193, %v835_v21   ;;  %v1037_v2 = vld [vmem:[%s2255_s4 + $0x58] sm:$0xff]  ;;  %v52_v4 = vld [vmem:[%s2254_s2 + $0x60] sm:$0xff] }
  0x24   :  { %252 = vmatpush.msra.mxu1 %v143_v7  ;;  %v27_v15 = vsub.f32 1.0, %v26_v12  ;;  %v1033_v3 = vld [vmem:[%s2255_s4 + $0x38] sm:$0xff]  ;;  %v53_v5 = vld [vmem:[%s2254_s2 + $0x68] sm:$0xff]  ;;  %v1038_v6 = vld [vmem:[%s2255_s4 + $0x60] sm:$0xff] }
  0x25   :  { %188 = vmatpush.msra.mxu0 %v109_v8  ;;  %v56_v14 = vld [vmem:[%s2254_s2 + $0x80] sm:$0xff] }
  0x26   :  { %253 = vmatpush.msra.mxu1 %v141_v9  ;;  %v28_v17 = vmul.f32 %v1198_v11, %v27_v15  ;;  %v1036_v9 = vld [vmem:[%s2255_s4 + $0x50] sm:$0xff]  ;;  %v57_v15 = vld [vmem:[%s2254_s2 + $0x88] sm:$0xff] }
  0x28   :  { %914 = vperm.xlu2 %1192, %v840_v10   ;;  %v29_v19 = vadd.f32 %v1198_v11, %v28_v17  ;;  %v54_v10 = vld [vmem:[%s2254_s2 + $0x70] sm:$0xff] }
  0x2a   :  { %919 = vperm.xlu1 %1194, %v841_v13   ;;  %v33_v22 = vsel %vm32_vm2, %v1198_v11, %v29_v19  ;;  %v55_v11 = vld [vmem:[%s2254_s2 + $0x78] sm:$0xff] }
  0x2b   :  { %v38_v24 = vsel %vm35_vm3, %v37_v18, %v33_v22  ;;  %924 = vperm.xlu0 %1193, %v842_v32   ;;  %v58_v18 = vld [vmem:[%s2254_s2 + $0x90] sm:$0xff]  ;;  %v59_v19 = vld [vmem:[%s2254_s2 + $0x98] sm:$0xff]  ;;  %v60_v22 = vld [vmem:[%s2254_s2 + $0xa0] sm:$0xff] }
  0x2c   :  { %v1493_v27 = vperm.slane %v38_v24, 0  ;;  %v1495_v28 = vperm.slane %v38_v24, 1  ;;  %v64_v32 = vld [vmem:[%s2254_s2 + $0xc0] sm:$0xff] }
  0x2e   :  { %v77_v29 = vmul.f32 %v1493_v27, %v40_v25  ;;  %v78_v30 = vmul.f32 %v1495_v28, %v41_v26  ;;  %v79_v36 = vmul.f32 %v1493_v27, %v42_v33  ;;  %v80_v37 = vmul.f32 %v1495_v28, %v43_v34  ;;  %v62_v26 = vld [vmem:[%s2254_s2 + $0xb0] sm:$0xff]  ;;  %v65_v33 = vld [vmem:[%s2254_s2 + $0xc8] sm:$0xff] }
  0x2f   :  { %v81_v43 = vmul.f32 %v1493_v27, %v44_v40  ;;  %v82_v44 = vmul.f32 %v1495_v28, %v45_v41  ;;  %v83_v50 = vmul.f32 %v1493_v27, %v46_v47  ;;  %v84_v51 = vmul.f32 %v1495_v28, %v47_v48  ;;  %v68_v40 = vld [vmem:[%s2254_s2 + $0xe0] sm:$0xff]  ;;  %v69_v41 = vld [vmem:[%s2254_s2 + $0xe8] sm:$0xff] }
  0x30   :  { %929 = vperm.xlu2 %1192, %v843_v20   ;;  %319 = vmatmul.f32.vlgmr.msra.gmra.mxu2 %v77_v29  ;;  %v85_v57 = vmul.f32 %v1493_v27, %v48_v54  ;;  %v86_v58 = vmul.f32 %v1495_v28, %v49_v55  ;;  %v87_v0 = vmul.f32 %v1493_v27, %v50_v61 }
  0x31   :  { %384 = vmatmul.f32.vlgmr.msra.gmra.mxu3 %v78_v30  ;;  %189 = vmatmul.f32.vlgmr.msra.gmra.mxu0 %v77_v29  ;;  %v88_v1 = vmul.f32 %v1495_v28, %v51_v62  ;;  %v89_v7 = vmul.f32 %v1493_v27, %v52_v4  ;;  %v90_v8 = vmul.f32 %v1495_v28, %v53_v5  ;;  %v63_v29 = vld [vmem:[%s2254_s2 + $0xb8] sm:$0xff] }
  0x32   :  { %934 = vperm.xlu1 %1194, %v844_v23   ;;  %254 = vmatmul.f32.vlgmr.msra.gmra.mxu1 %v78_v30  ;;  %v91_v12 = vmul.f32 %v1493_v27, %v54_v10  ;;  %v92_v13 = vmul.f32 %v1495_v28, %v55_v11  ;;  %v93_v16 = vmul.f32 %v1493_v27, %v56_v14  ;;  %v61_v23 = vld [vmem:[%s2254_s2 + $0xa8] sm:$0xff] }
  0x33   :  { %939 = vperm.xlu0 %1193, %v845_v39   ;;  %v94_v17 = vmul.f32 %v1495_v28, %v57_v15  ;;  %v95_v20 = vmul.f32 %v1493_v27, %v58_v18  ;;  %v96_v21 = vmul.f32 %v1495_v28, %v59_v19  ;;  %v97_v24 = vmul.f32 %v1493_v27, %v60_v22 }
  0x34   :  { %v98_v25 = vmul.f32 %v1495_v28, %v61_v23  ;;  %v99_v30 = vmul.f32 %v1493_v27, %v62_v26  ;;  %v101_v34 = vmul.f32 %v1493_v27, %v64_v32 }
  0x38   :  { %944 = vperm.xlu2 %1192, %v846_v31   ;;  %322 = vmatmul.f32.gmra.mxu2 %v79_v36  ;;  %v100_v31 = vmul.f32 %v1495_v28, %v63_v29 }
  0x39   :  { %387 = vmatmul.f32.gmra.mxu3 %v80_v37  ;;  %192 = vmatmul.f32.gmra.mxu0 %v79_v36  ;;  %v66_v36 = vld [vmem:[%s2254_s2 + $0xd0] sm:$0xff] }
  0x3a   :  { %949 = vperm.xlu1 %1194, %v847_v35   ;;  %257 = vmatmul.f32.gmra.mxu1 %v80_v37  ;;  %v102_v35 = vmul.f32 %v1495_v28, %v65_v33  ;;  %v67_v37 = vld [vmem:[%s2254_s2 + $0xd8] sm:$0xff] }
  0x3b   :  { %954 = vperm.xlu0 %1193, %v848_v46   ;;  %v104_v39 = vmul.f32 %v1495_v28, %v67_v37 }
  0x40   :  { %959 = vperm.xlu2 %1192, %v849_v38   ;;  %325 = vmatmul.f32.gmra.mxu2 %v81_v43  ;;  %v103_v38 = vmul.f32 %v1493_v27, %v66_v36 }
  0x41   :  { %390 = vmatmul.f32.gmra.mxu3 %v82_v44  ;;  %195 = vmatmul.f32.gmra.mxu0 %v81_v43  ;;  %v106_v43 = vmul.f32 %v1495_v28, %v69_v41 }
  0x42   :  { %1044 = vperm.xlu1 %1194, %v1026_v42   ;;  %260 = vmatmul.f32.gmra.mxu1 %v82_v44  ;;  %v105_v42 = vmul.f32 %v1493_v27, %v68_v40  ;;  %v70_v44 = vld [vmem:[%s2254_s2 + $0xf0] sm:$0xff] }
  0x43   :  { %1049 = vperm.xlu0 %1193, %v1027_v53   ;;  %v107_v46 = vmul.f32 %v1493_v27, %v70_v44 }
  0x48   :  { %1054 = vperm.xlu2 %1192, %v1028_v45   ;;  %328 = vmatmul.f32.gmra.mxu2 %v83_v50  ;;  %v71_v45 = vld [vmem:[%s2254_s2 + $0xf8] sm:$0xff] }
  0x49   :  { %393 = vmatmul.f32.gmra.mxu3 %v84_v51  ;;  %198 = vmatmul.f32.gmra.mxu0 %v83_v50  ;;  %v108_v47 = vmul.f32 %v1495_v28, %v71_v45 }
  0x4a   :  { %1059 = vperm.xlu1 %1194, %v1029_v49   ;;  %263 = vmatmul.f32.gmra.mxu1 %v84_v51 }
  0x4b   :  { %1064 = vperm.xlu0 %1193, %v1030_v60  }
  0x50   :  { %1069 = vperm.xlu2 %1192, %v1031_v52   ;;  %331 = vmatmul.f32.gmra.mxu2 %v85_v57 }
  0x51   :  { %396 = vmatmul.f32.gmra.mxu3 %v86_v58  ;;  %201 = vmatmul.f32.gmra.mxu0 %v85_v57 }
  0x52   :  { %1074 = vperm.xlu1 %1194, %v1032_v56   ;;  %266 = vmatmul.f32.gmra.mxu1 %v86_v58 }
  0x53   :  { %1079 = vperm.xlu0 %1193, %v1033_v3  }
  0x58   :  { %1084 = vperm.xlu2 %1192, %v1034_v59   ;;  %334 = vmatmul.f32.gmra.mxu2 %v87_v0 }
  0x59   :  { %399 = vmatmul.f32.gmra.mxu3 %v88_v1  ;;  %204 = vmatmul.f32.gmra.mxu0 %v87_v0 }
  0x5a   :  { %1089 = vperm.xlu1 %1194, %v1035_v63   ;;  %269 = vmatmul.f32.gmra.mxu1 %v88_v1 }
  0x5b   :  { %1094 = vperm.xlu0 %1193, %v1036_v9  }
  0x60   :  { %1099 = vperm.xlu2 %1192, %v1037_v2   ;;  %337 = vmatmul.f32.gmra.mxu2 %v89_v7 }
  0x61   :  { %402 = vmatmul.f32.gmra.mxu3 %v90_v8  ;;  %207 = vmatmul.f32.gmra.mxu0 %v89_v7 }
  0x62   :  { %1104 = vperm.xlu1 %1194, %v1038_v6   ;;  %272 = vmatmul.f32.gmra.mxu1 %v90_v8 }
  0x68   :  { %340 = vmatmul.f32.gmra.mxu2 %v91_v12 }
  0x69   :  { %405 = vmatmul.f32.gmra.mxu3 %v92_v13  ;;  %210 = vmatmul.f32.gmra.mxu0 %v91_v12  ;;  %v1704_v12 = vpop.permute.xlu2 %884 }
  0x6a   :  { %275 = vmatmul.f32.gmra.mxu1 %v92_v13 }
  0x70   :  { %343 = vmatmul.f32.gmra.mxu2 %v93_v16 }
  0x71   :  { %408 = vmatmul.f32.gmra.mxu3 %v94_v17  ;;  %213 = vmatmul.f32.gmra.mxu0 %v93_v16 }
  0x72   :  { %278 = vmatmul.f32.gmra.mxu1 %v94_v17 }
  0x78   :  { %346 = vmatmul.f32.gmra.mxu2 %v95_v20 }
  0x79   :  { %411 = vmatmul.f32.gmra.mxu3 %v96_v21  ;;  %216 = vmatmul.f32.gmra.mxu0 %v95_v20 }
  0x7a   :  { %281 = vmatmul.f32.gmra.mxu1 %v96_v21 }
  0x80   :  { %349 = vmatmul.f32.gmra.mxu2 %v97_v24 }
  0x81   :  { %414 = vmatmul.f32.gmra.mxu3 %v98_v25  ;;  %219 = vmatmul.f32.gmra.mxu0 %v97_v24 }
  0x82   :  { %284 = vmatmul.f32.gmra.mxu1 %v98_v25 }
  0x88   :  { %352 = vmatmul.f32.gmra.mxu2 %v99_v30 }
  0x89   :  { %417 = vmatmul.f32.gmra.mxu3 %v100_v31  ;;  %222 = vmatmul.f32.gmra.mxu0 %v99_v30 }
  0x8a   :  { %287 = vmatmul.f32.gmra.mxu1 %v100_v31  ;;  %v1722_v31 = vpop.permute.xlu2 %899 }
  0x8b   :  { %v1706_v13 = vpop.permute.xlu1 %894 }
  0x90   :  { %355 = vmatmul.f32.gmra.mxu2 %v101_v34 }
  0x91   :  { %420 = vmatmul.f32.gmra.mxu3 %v102_v35  ;;  %225 = vmatmul.f32.gmra.mxu0 %v101_v34 }
  0x92   :  { %290 = vmatmul.f32.gmra.mxu1 %v102_v35 }
  0x94   :  { %v1725_v33 = vpop.permute.xlu1 %909 }
  0x98   :  { %358 = vmatmul.f32.gmra.mxu2 %v103_v38 }
  0x99   :  { %423 = vmatmul.f32.gmra.mxu3 %v104_v39  ;;  %228 = vmatmul.f32.gmra.mxu0 %v103_v38 }
  0x9a   :  { %293 = vmatmul.f32.gmra.mxu1 %v104_v39 }
  0xa0   :  { %361 = vmatmul.f32.gmra.mxu2 %v105_v42 }
  0xa1   :  { %426 = vmatmul.f32.gmra.mxu3 %v106_v43  ;;  %231 = vmatmul.f32.gmra.mxu0 %v105_v42 }
  0xa2   :  { %296 = vmatmul.f32.gmra.mxu1 %v106_v43 }
  0xa8   :  { %364 = vmatmul.f32.gmra.mxu2 %v107_v46 }
  0xa9   :  { %429 = vmatmul.f32.gmra.mxu3 %v108_v47  ;;  %234 = vmatmul.f32.gmra.mxu0 %v107_v46 }
  0xaa   :  { %299 = vmatmul.f32.gmra.mxu1 %v108_v47  ;;  %v1741_v47 = vpop.permute.xlu2 %904 }
  0xae   :  { %v190_v48 = vpop.f32.mrf.mxu0 }
  0xaf   :  { %v255_v49 = vpop.f32.mrf.mxu1 }
  0xb0   :  { %v1676_v50 = vadd.f32 %v255_v49, %v190_v48  ;;  %v1745_v49 = vpop.permute.xlu1 %919 }
  0xb2   :  { %v514_v54 = vmul.f32 %v1676_v50, %v1676_v50 }
  0xb3   :  { %v320_v51 = vpop.f32.mrf.mxu2 }
  0xb4   :  { %v385_v52 = vpop.f32.mrf.mxu3 }
  0xb5   :  { %v1678_v53 = vadd.f32 %v385_v52, %v320_v51  ;;  %v1747_v51 = vpop.permute.xlu0 %889 }
  0xb6   :  { %v193_v55 = vpop.f32.mrf.mxu0 }
  0xb7   :  { %v434_v27 = vsel %vm433_vm4, %v1678_v53, 0.0  ;;  %v515_v28 = vmul.f32 %v1678_v53, %v1678_v53  ;;  %v258_v56 = vpop.f32.mrf.mxu1 }
  0xb8   :  { %v435_v57 = vadd.f32 %v434_v27, %v1676_v50  ;;  %v1688_v60 = vadd.f32 %v258_v56, %v193_v55 }
  0xb9   :  { %v546_v58 = vsel %vm433_vm4, %v515_v28, 0.0 }
  0xba   :  { %436 = vadd.xlane.f32.xlu0 %v435_v57  ;;  %v547_v59 = vadd.f32 %v546_v58, %v514_v54  ;;  %v516_v0 = vmul.f32 %v1688_v60, %v1688_v60 }
  0xbb   :  { %v323_v61 = vpop.f32.mrf.mxu2 }
  0xbc   :  { %v388_v62 = vpop.f32.mrf.mxu3  ;;  %548 = vadd.xlane.f32.xlu1 %v547_v59 }
  0xbd   :  { %v1690_v63 = vadd.f32 %v388_v62, %v323_v61 }
  0xbe   :  { %v196_v3 = vpop.f32.mrf.mxu0 }
  0xbf   :  { %v438_v1 = vsel %vm433_vm4, %v1690_v63, 0.0  ;;  %v517_v2 = vmul.f32 %v1690_v63, %v1690_v63  ;;  %v261_v4 = vpop.f32.mrf.mxu1 }
  0xc0   :  { %v439_v5 = vadd.f32 %v438_v1, %v1688_v60  ;;  %v1700_v8 = vadd.f32 %v261_v4, %v196_v3  ;;  %v1761_v4 = vpop.permute.xlu2 %914 }
  0xc1   :  { %v550_v6 = vsel %vm433_vm4, %v517_v2, 0.0 }
  0xc2   :  { %440 = vadd.xlane.f32.xlu0 %v439_v5  ;;  %v551_v7 = vadd.f32 %v550_v6, %v516_v0  ;;  %v518_v14 = vmul.f32 %v1700_v8, %v1700_v8 }
  0xc3   :  { %v326_v9 = vpop.f32.mrf.mxu2 }
  0xc4   :  { %v391_v10 = vpop.f32.mrf.mxu3  ;;  %552 = vadd.xlane.f32.xlu2 %v551_v7  ;;  %v1767_v7 = vpop.permute.xlu1 %934 }
  0xc5   :  { %v1702_v11 = vadd.f32 %v391_v10, %v326_v9  ;;  %2276 = vst [vmem:[#allocation2_spill] sm:$0xff] %v1767_v7  ;;  %v1769_v9 = vpop.permute.xlu0 %924 }
  0xc6   :  { %v199_v17 = vpop.f32.mrf.mxu0 }
  0xc7   :  { %v442_v15 = vsel %vm433_vm4, %v1702_v11, 0.0  ;;  %v519_v16 = vmul.f32 %v1702_v11, %v1702_v11  ;;  %v264_v18 = vpop.f32.mrf.mxu1 }
  0xc8   :  { %v443_v19 = vadd.f32 %v442_v15, %v1700_v8  ;;  %v1716_v24 = vadd.f32 %v264_v18, %v199_v17 }
  0xc9   :  { %v554_v20 = vsel %vm433_vm4, %v519_v16, 0.0 }
  0xca   :  { %444 = vadd.xlane.f32.xlu1 %v443_v19  ;;  %v555_v21 = vadd.f32 %v554_v20, %v518_v14  ;;  %v520_v38 = vmul.f32 %v1716_v24, %v1716_v24 }
  0xcb   :  { %v329_v22 = vpop.f32.mrf.mxu2 }
  0xcc   :  { %v394_v23 = vpop.f32.mrf.mxu3  ;;  %556 = vadd.xlane.f32.xlu0 %v555_v21 }
  0xcd   :  { %v1718_v25 = vadd.f32 %v394_v23, %v329_v22 }
  0xce   :  { %v202_v29 = vpop.f32.mrf.mxu0 }
  0xcf   :  { %v446_v26 = vsel %vm433_vm4, %v1718_v25, 0.0  ;;  %v267_v30 = vpop.f32.mrf.mxu1  ;;  %v521_v34 = vmul.f32 %v1718_v25, %v1718_v25 }
  0xd0   :  { %v447_v32 = vadd.f32 %v446_v26, %v1716_v24  ;;  %v1729_v37 = vadd.f32 %v267_v30, %v202_v29 }
  0xd1   :  { %v558_v40 = vsel %vm433_vm4, %v521_v34, 0.0 }
  0xd2   :  { %448 = vadd.xlane.f32.xlu1 %v447_v32  ;;  %v559_v44 = vadd.f32 %v558_v40, %v520_v38  ;;  %v522_v27 = vmul.f32 %v1729_v37, %v1729_v37  ;;  %v1790_v38 = vpop.permute.xlu2 %929  ;;  %v1792_v40 = vpop.permute.xlu1 %949 }
  0xd3   :  { %v332_v35 = vpop.f32.mrf.mxu2  ;;  %2277 = vst [vmem:[#allocation3_spill] sm:$0xff] %v1792_v40 }
  0xd4   :  { %v397_v36 = vpop.f32.mrf.mxu3 }
  0xd5   :  { %v1733_v39 = vadd.f32 %v397_v36, %v332_v35 }
  0xd6   :  { %v205_v42 = vpop.f32.mrf.mxu0 }
  0xd7   :  { %v450_v41 = vsel %vm433_vm4, %v1733_v39, 0.0  ;;  %v270_v43 = vpop.f32.mrf.mxu1  ;;  %v523_v46 = vmul.f32 %v1733_v39, %v1733_v39 }
  0xd8   :  { %v451_v45 = vadd.f32 %v450_v41, %v1729_v37  ;;  %v1743_v48 = vadd.f32 %v270_v43, %v205_v42  ;;  %v1794_v41 = vpop.permute.xlu0 %939 }
  0xd9   :  { %v562_v55 = vsel %vm433_vm4, %v523_v46, 0.0  ;;  %2278 = vst [vmem:[#allocation4_spill] sm:$0xff] %v1794_v41 }
  0xda   :  { %560 = vadd.xlane.f32.xlu1 %v559_v44  ;;  %452 = vadd.xlane.f32.xlu2 %v451_v45  ;;  %v524_v56 = vmul.f32 %v1743_v48, %v1743_v48  ;;  %v563_v61 = vadd.f32 %v562_v55, %v522_v27 }
  0xdb   :  { %v335_v52 = vpop.f32.mrf.mxu2 }
  0xdc   :  { %v400_v54 = vpop.f32.mrf.mxu3 }
  0xdd   :  { %v1751_v28 = vadd.f32 %v400_v54, %v335_v52 }
  0xde   :  { %v208_v58 = vpop.f32.mrf.mxu0 }
  0xdf   :  { %v525_v57 = vmul.f32 %v1751_v28, %v1751_v28  ;;  %v273_v59 = vpop.f32.mrf.mxu1  ;;  %v454_v6 = vsel %vm433_vm4, %v1751_v28, 0.0 }
  0xe0   :  { %v1759_v1 = vadd.f32 %v273_v59, %v208_v58  ;;  %v455_v18 = vadd.f32 %v454_v6, %v1743_v48  ;;  %v1816_v6 = vpop.permute.xlu0 %954 }
  0xe1   :  { %v566_v62 = vsel %vm433_vm4, %v525_v57, 0.0  ;;  %2280 = vst [vmem:[#allocation6_spill] sm:$0xff] %v1816_v6 }
  0xe2   :  { %564 = vadd.xlane.f32.xlu2 %v563_v61  ;;  %v567_v0 = vadd.f32 %v566_v62, %v524_v56  ;;  %v526_v10 = vmul.f32 %v1759_v1, %v1759_v1  ;;  %v1809_v61 = vpop.permute.xlu2 %944 }
  0xe3   :  { %v338_v2 = vpop.f32.mrf.mxu2  ;;  %2279 = vst [vmem:[#allocation5_spill] sm:$0xff] %v1809_v61 }
  0xe4   :  { %v403_v3 = vpop.f32.mrf.mxu3  ;;  %568 = vadd.xlane.f32.xlu0 %v567_v0 }
  0xe5   :  { %v1763_v5 = vadd.f32 %v403_v3, %v338_v2  ;;  %v1814_v3 = vpop.permute.xlu1 %1044 }
  0xe6   :  { %v211_v16 = vpop.f32.mrf.mxu0 }
  0xe7   :  { %v527_v14 = vmul.f32 %v1763_v5, %v1763_v5  ;;  %v458_v15 = vsel %vm433_vm4, %v1763_v5, 0.0  ;;  %v276_v17 = vpop.f32.mrf.mxu1 }
  0xe8   :  { %v459_v21 = vadd.f32 %v458_v15, %v1759_v1  ;;  %v1780_v22 = vadd.f32 %v276_v17, %v211_v16 }
  0xe9   :  { %v570_v19 = vsel %vm433_vm4, %v527_v14, 0.0 }
  0xea   :  { %456 = vadd.xlane.f32.xlu2 %v455_v18  ;;  %v571_v20 = vadd.f32 %v570_v19, %v526_v10  ;;  %v528_v30 = vmul.f32 %v1780_v22, %v1780_v22 }
  0xeb   :  { %v341_v23 = vpop.f32.mrf.mxu2 }
  0xec   :  { %v406_v26 = vpop.f32.mrf.mxu3  ;;  %572 = vadd.xlane.f32.xlu1 %v571_v20  ;;  %460 = vadd.xlane.f32.xlu0 %v459_v21 }
  0xed   :  { %v1782_v29 = vadd.f32 %v406_v26, %v341_v23 }
  0xee   :  { %v214_v35 = vpop.f32.mrf.mxu0 }
  0xef   :  { %v529_v32 = vmul.f32 %v1782_v29, %v1782_v29  ;;  %v462_v34 = vsel %vm433_vm4, %v1782_v29, 0.0  ;;  %v279_v36 = vpop.f32.mrf.mxu1 }
  0xf0   :  { %v463_v44 = vadd.f32 %v462_v34, %v1780_v22  ;;  %v1798_v45 = vadd.f32 %v279_v36, %v214_v35  ;;  %v1830_v35 = vpop.permute.xlu2 %959 }
  0xf1   :  { %v574_v42 = vsel %vm433_vm4, %v529_v32, 0.0  ;;  %2281 = vst [vmem:[#allocation7_spill] sm:$0xff] %v1830_v35 }
  0xf2   :  { %v575_v43 = vadd.f32 %v574_v42, %v528_v30  ;;  %v530_v27 = vmul.f32 %v1798_v45, %v1798_v45  ;;  %v1834_v42 = vpop.permute.xlu1 %1059 }
  0xf3   :  { %v344_v46 = vpop.f32.mrf.mxu2 }
  0xf4   :  { %v409_v52 = vpop.f32.mrf.mxu3  ;;  %576 = vadd.xlane.f32.xlu2 %v575_v43  ;;  %464 = vadd.xlane.f32.xlu1 %v463_v44  ;;  %v1836_v43 = vpop.permute.xlu0 %1049 }
  0xf5   :  { %v1800_v54 = vadd.f32 %v409_v52, %v344_v46 }
  0xf6   :  { %v217_v57 = vpop.f32.mrf.mxu0 }
  0xf7   :  { %v531_v55 = vmul.f32 %v1800_v54, %v1800_v54  ;;  %v466_v56 = vsel %vm433_vm4, %v1800_v54, 0.0  ;;  %v282_v58 = vpop.f32.mrf.mxu1 }
  0xf8   :  { %v467_v0 = vadd.f32 %v466_v56, %v1798_v45  ;;  %v1812_v2 = vadd.f32 %v282_v58, %v217_v57 }
  0xf9   :  { %v578_v59 = vsel %vm433_vm4, %v531_v55, 0.0 }
  0xfa   :  { %v579_v62 = vadd.f32 %v578_v59, %v530_v27  ;;  %v532_v16 = vmul.f32 %v1812_v2, %v1812_v2 }
  0xfb   :  { %v347_v10 = vpop.f32.mrf.mxu2 }
  0xfc   :  { %v412_v14 = vpop.f32.mrf.mxu3  ;;  %580 = vadd.xlane.f32.xlu0 %v579_v62  ;;  %468 = vadd.xlane.f32.xlu2 %v467_v0 }
  0xfd   :  { %v1818_v15 = vadd.f32 %v412_v14, %v347_v10 }
  0xfe   :  { %v220_v19 = vpop.f32.mrf.mxu0 }
  0xff   :  { %v533_v17 = vmul.f32 %v1818_v15, %v1818_v15  ;;  %v470_v18 = vsel %vm433_vm4, %v1818_v15, 0.0  ;;  %v285_v20 = vpop.f32.mrf.mxu1 }
 0x100   :  { %v471_v26 = vadd.f32 %v470_v18, %v1812_v2  ;;  %v1828_v30 = vadd.f32 %v285_v20, %v220_v19  ;;  %v1856_v20 = vpop.permute.xlu2 %1054 }
 0x101   :  { %v582_v21 = vsel %vm433_vm4, %v533_v17, 0.0 }
 0x102   :  { %v583_v23 = vadd.f32 %v582_v21, %v532_v16  ;;  %v534_v44 = vmul.f32 %v1828_v30, %v1828_v30  ;;  %v1858_v21 = vpop.permute.xlu1 %1074 }
 0x103   :  { %v350_v32 = vpop.f32.mrf.mxu2 }
 0x104   :  { %v415_v34 = vpop.f32.mrf.mxu3  ;;  %584 = vadd.xlane.f32.xlu1 %v583_v23  ;;  %472 = vadd.xlane.f32.xlu0 %v471_v26  ;;  %v1860_v23 = vpop.permute.xlu0 %1064 }
 0x105   :  { %v1832_v36 = vadd.f32 %v415_v34, %v350_v32 }
 0x106   :  { %v223_v27 = vpop.f32.mrf.mxu0 }
 0x107   :  { %v535_v46 = vmul.f32 %v1832_v36, %v1832_v36  ;;  %v474_v52 = vsel %vm433_vm4, %v1832_v36, 0.0  ;;  %v288_v55 = vpop.f32.mrf.mxu1 }
 0x108   :  { %v475_v58 = vadd.f32 %v474_v52, %v1828_v30  ;;  %v1846_v59 = vadd.f32 %v288_v55, %v223_v27 }
 0x109   :  { %v586_v56 = vsel %vm433_vm4, %v535_v46, 0.0 }
 0x10a   :  { %v587_v57 = vadd.f32 %v586_v56, %v534_v44  ;;  %2282 = vst [vmem:[#allocation8_spill] sm:$0xff] %v1846_v59  ;;  %v536_v14 = vmul.f32 %v1846_v59, %v1846_v59 }
 0x10b   :  { %v353_v62 = vpop.f32.mrf.mxu2 }
 0x10c   :  { %v418_v0 = vpop.f32.mrf.mxu3  ;;  %588 = vadd.xlane.f32.xlu2 %v587_v57  ;;  %476 = vadd.xlane.f32.xlu1 %v475_v58 }
 0x10d   :  { %v1848_v10 = vadd.f32 %v418_v0, %v353_v62 }
 0x10e   :  { %v226_v18 = vpop.f32.mrf.mxu0 }
 0x10f   :  { %2283 = vst [vmem:[#allocation9_spill] sm:$0xff] %v1848_v10  ;;  %v537_v16 = vmul.f32 %v1848_v10, %v1848_v10  ;;  %v478_v17 = vsel %vm433_vm4, %v1848_v10, 0.0  ;;  %v291_v19 = vpop.f32.mrf.mxu1 }
 0x110   :  { %v479_v34 = vadd.f32 %v478_v17, %v1846_v59  ;;  %v1864_v44 = vadd.f32 %v291_v19, %v226_v18  ;;  %v1880_v19 = vpop.permute.xlu1 %1089 }
 0x111   :  { %v590_v26 = vsel %vm433_vm4, %v537_v16, 0.0 }
 0x112   :  { %v591_v32 = vadd.f32 %v590_v26, %v536_v14  ;;  %2284 = vst [vmem:[#allocation10_spill] sm:$0xff] %v1864_v44  ;;  %v538_v55 = vmul.f32 %v1864_v44, %v1864_v44  ;;  %v1875_v14 = vpop.permute.xlu2 %1069  ;;  %v1882_v26 = vpop.permute.xlu0 %1079 }
 0x113   :  { %v356_v46 = vpop.f32.mrf.mxu2 }
 0x114   :  { %v421_v52 = vpop.f32.mrf.mxu3  ;;  %592 = vadd.xlane.f32.xlu0 %v591_v32  ;;  %480 = vadd.xlane.f32.xlu2 %v479_v34 }
 0x115   :  { %v1866_v27 = vadd.f32 %v421_v52, %v356_v46 }
 0x116   :  { %v229_v58 = vpop.f32.mrf.mxu0 }
 0x117   :  { %2285 = vst [vmem:[#allocation11_spill] sm:$0xff] %v1866_v27  ;;  %v539_v56 = vmul.f32 %v1866_v27, %v1866_v27  ;;  %v482_v57 = vsel %vm433_vm4, %v1866_v27, 0.0  ;;  %v294_v62 = vpop.f32.mrf.mxu1 }
 0x118   :  { %v483_v17 = vadd.f32 %v482_v57, %v1864_v44  ;;  %v1878_v18 = vadd.f32 %v294_v62, %v229_v58 }
 0x119   :  { %v594_v0 = vsel %vm433_vm4, %v539_v56, 0.0 }
 0x11a   :  { %v595_v16 = vadd.f32 %v594_v0, %v538_v55  ;;  %2286 = vst [vmem:[#allocation12_spill] sm:$0xff] %v1878_v18  ;;  %v540_v52 = vmul.f32 %v1878_v18, %v1878_v18  ;;  %v1898_v6 = vpop.permute.xlu0 %1094 }
 0x11b   :  { %v359_v32 = vpop.f32.mrf.mxu2  ;;  %2289 = vst [vmem:[#allocation15_spill] sm:$0xff] %v1898_v6 }
 0x11c   :  { %v424_v34 = vpop.f32.mrf.mxu3  ;;  %596 = vadd.xlane.f32.xlu1 %v595_v16  ;;  %484 = vadd.xlane.f32.xlu0 %v483_v17 }
 0x11d   :  { %v1884_v46 = vadd.f32 %v424_v34, %v359_v32  ;;  %v1896_v34 = vpop.permute.xlu2 %1084 }
 0x11e   :  { %v232_v57 = vpop.f32.mrf.mxu0 }
 0x11f   :  { %2287 = vst [vmem:[#allocation13_spill] sm:$0xff] %v1884_v46  ;;  %v541_v55 = vmul.f32 %v1884_v46, %v1884_v46  ;;  %v486_v56 = vsel %vm433_vm4, %v1884_v46, 0.0  ;;  %v297_v58 = vpop.f32.mrf.mxu1  ;;  %v1902_v46 = vpop.permute.xlu1 %1104 }
 0x120   :  { %v487_v35 = vadd.f32 %v486_v56, %v1878_v18  ;;  %v1894_v16 = vadd.f32 %v297_v58, %v232_v57  ;;  %2291 = vst [vmem:[#allocation17_spill] sm:$0xff] %v1902_v46 }
 0x121   :  { %v598_v62 = vsel %vm433_vm4, %v541_v55, 0.0 }
 0x122   :  { %v599_v0 = vadd.f32 %v598_v62, %v540_v52  ;;  %2288 = vst [vmem:[#allocation14_spill] sm:$0xff] %v1894_v16  ;;  %v542_v55 = vmul.f32 %v1894_v16, %v1894_v16 }
 0x123   :  { %v362_v17 = vpop.f32.mrf.mxu2 }
 0x124   :  { %v427_v32 = vpop.f32.mrf.mxu3  ;;  %600 = vadd.xlane.f32.xlu2 %v599_v0  ;;  %488 = vadd.xlane.f32.xlu1 %v487_v35 }
 0x125   :  { %v1900_v40 = vadd.f32 %v427_v32, %v362_v17  ;;  %v1918_v44 = vpop.permute.xlu2 %1099 }
 0x126   :  { %v235_v58 = vpop.f32.mrf.mxu0  ;;  %2294 = vst [vmem:[#allocation20_spill] sm:$0xff] %v1918_v44 }
 0x127   :  { %2290 = vst [vmem:[#allocation16_spill] sm:$0xff] %v1900_v40  ;;  %v543_v52 = vmul.f32 %v1900_v40, %v1900_v40  ;;  %v490_v56 = vsel %vm433_vm4, %v1900_v40, 0.0  ;;  %v300_v57 = vpop.f32.mrf.mxu1 }
 0x128   :  { %v491_v0 = vadd.f32 %v490_v56, %v1894_v16  ;;  %v1912_v17 = vadd.f32 %v300_v57, %v235_v58 }
 0x129   :  { %v602_v35 = vsel %vm433_vm4, %v543_v52, 0.0 }
 0x12a   :  { %v603_v62 = vadd.f32 %v602_v35, %v542_v55  ;;  %2292 = vst [vmem:[#allocation18_spill] sm:$0xff] %v1912_v17  ;;  %v544_v40 = vmul.f32 %v1912_v17, %v1912_v17 }
 0x12b   :  { %v365_v32 = vpop.f32.mrf.mxu2 }
 0x12c   :  { %v430_v18 = vpop.f32.mrf.mxu3  ;;  %604 = vadd.xlane.f32.xlu0 %v603_v62  ;;  %492 = vadd.xlane.f32.xlu2 %v491_v0 }
 0x12d   :  { %v1914_v46 = vadd.f32 %v430_v18, %v365_v32  ;;  %v437_v61 = vpop.xlane.xlu0 %436 }
 0x12e   :  { %v498_v27 = vmul.f32 0.0051020407, %v437_v61 }
 0x12f   :  { %2293 = vst [vmem:[#allocation19_spill] sm:$0xff] %v1914_v46  ;;  %v549_v41 = vpop.xlane.xlu1 %548  ;;  %v545_v55 = vmul.f32 %v1914_v46, %v1914_v46  ;;  %v494_v52 = vsel %vm433_vm4, %v1914_v46, 0.0 }
 0x130   :  { %v610_v56 = vmul.f32 0.0051020407, %v549_v41  ;;  %v626_v57 = vmul.f32 %v498_v27, %v498_v27  ;;  %v495_v18 = vadd.f32 %v494_v52, %v1912_v17 }
 0x131   :  { %v606_v58 = vsel %vm433_vm4, %v545_v55, 0.0 }
 0x132   :  { %v642_v35 = vsub.f32 %v610_v56, %v626_v57  ;;  %v607_v61 = vadd.f32 %v606_v58, %v544_v40 }
 0x134   :  { %v658_v62 = vadd.f32 0.001, %v642_v35  ;;  %608 = vadd.xlane.f32.xlu1 %v607_v61  ;;  %496 = vadd.xlane.f32.xlu0 %v495_v18 }
 0x135   :  { %v441_v0 = vpop.xlane.xlu0 %440 }
 0x136   :  { %1199 = vrsqrt.f32 %v658_v62  ;;  %v499_v32 = vmul.f32 0.0051020407, %v441_v0  ;;  %vm680_vm6 = vweird.f32 %v658_v62 }
 0x137   :  { %v553_v16 = vpop.xlane.xlu2 %552 }
 0x138   :  { %v611_v44 = vmul.f32 0.0051020407, %v553_v16  ;;  %v627_v6 = vmul.f32 %v499_v32, %v499_v32  ;;  %v1040_v16 = vld [vmem:[%s2255_s4 + $0x70] sm:$0xff] }
 0x13a   :  { %v643_v10 = vsub.f32 %v611_v44, %v627_v6  ;;  %v850_v6 = vsub.f32 %v1676_v50, %v498_v27 }
 0x13c   :  { %v1200_v59 = vpop.eup %1199  ;;  %v659_v46 = vadd.f32 0.001, %v643_v10  ;;  %v851_v10 = vsub.f32 %v1678_v53, %v498_v27 }
 0x13d   :  { %v675_v41 = vmul.f32 %v1200_v59, %v658_v62  ;;  %v445_v7 = vpop.xlane.xlu1 %444  ;;  %vm681_vm5 = vweird.f32 %v1200_v59 }
 0x13e   :  { %1201 = vrsqrt.f32 %v659_v46  ;;  %v1926_v55 = vmul.f32 0.0051020407, %v445_v7  ;;  %v963_v50 = vmul.f32 %v1704_v12, %v851_v10  ;;  %vm682_vm7 = vmor %vm680_vm6, %vm681_vm5  ;;  %vm690_vm9 = vweird.f32 %v659_v46 }
 0x13f   :  { %v676_v52 = vmul.f32 %v1200_v59, %v675_v41  ;;  %v557_v56 = vpop.xlane.xlu0 %556 }
 0x140   :  { %v612_v40 = vmul.f32 0.0051020407, %v557_v56  ;;  %v628_v57 = vmul.f32 %v1926_v55, %v1926_v55  ;;  %v962_v56 = vmul.f32 %v1704_v12, %v850_v6  ;;  %v1041_v12 = vld [vmem:[%s2255_s4 + $0x78] sm:$0xff] }
 0x141   :  { %v677_v58 = vmul.f32 0.5, %v676_v52  ;;  %v1039_v52 = vld [vmem:[%s2255_s4 + $0x68] sm:$0xff] }
 0x142   :  { %v644_v44 = vsub.f32 %v612_v40, %v628_v57 }
 0x143   :  { %v678_v18 = vsub.f32 1.5, %v677_v58  ;;  %v852_v58 = vsub.f32 %v1688_v60, %v499_v32 }
 0x144   :  { %v1202_v7 = vpop.eup %1201  ;;  %v660_v35 = vadd.f32 0.001, %v644_v44  ;;  %1114 = vperm.xlu2 %1192, %v1040_v16  }
 0x145   :  { %v679_v61 = vmul.f32 %v1200_v59, %v678_v18  ;;  %v685_v0 = vmul.f32 %v1202_v7, %v659_v46  ;;  %v449_v41 = vpop.xlane.xlu1 %448  ;;  %v853_v18 = vsub.f32 %v1690_v63, %v499_v32  ;;  %vm691_vm8 = vweird.f32 %v1202_v7 }
 0x146   :  { %1203 = vrsqrt.f32 %v660_v35  ;;  %v1944_v17 = vmul.f32 0.0051020407, %v449_v41  ;;  %v964_v10 = vmul.f32 %v1747_v51, %v852_v58  ;;  %vm692_vm10 = vmor %vm690_vm9, %vm691_vm8  ;;  %v854_v46 = vsub.f32 %v1700_v8, %v1926_v55 }
 0x147   :  { %v683_v53 = vsel %vm682_vm7, %v1200_v59, %v679_v61  ;;  %v686_v27 = vmul.f32 %v1202_v7, %v685_v0  ;;  %v965_v61 = vmul.f32 %v1747_v51, %v853_v18  ;;  %vm700_vm12 = vweird.f32 %v660_v35 }
 0x148   :  { %v994_v40 = vmul.f32 %v962_v56, %v683_v53  ;;  %v995_v57 = vmul.f32 %v963_v50, %v683_v53  ;;  %1109 = vperm.xlu0 %1193, %v1039_v52   ;;  %v629_v0 = vmul.f32 %v1944_v17, %v1944_v17 }
 0x149   :  { %v687_v62 = vmul.f32 0.5, %v686_v27 }
 0x14a   :  { %v1122_v16 = vadd.f32 %v1814_v3, %v994_v40  ;;  %v1123_v44 = vadd.f32 %v1814_v3, %v995_v57  ;;  %v855_v40 = vsub.f32 %v1702_v11, %v1926_v55 }
 0x14b   :  { %v688_v59 = vsub.f32 1.5, %v687_v62 }
 0x14c   :  { %v1204_v6 = vpop.eup %1203  ;;  %1154 = vst [vmem:[%s2256_s5] sm:$0xff] %v1122_v16  ;;  %v967_v55 = vmul.f32 %v1706_v13, %v855_v40 }
 0x14d   :  { %1155 = vst.msk [vmem:[%s2256_s5 + $0x8] sm:$0xff] %vm433_vm4, %v1123_v44  ;;  %v689_v60 = vmul.f32 %v1202_v7, %v688_v59  ;;  %v695_v63 = vmul.f32 %v1204_v6, %v660_v35  ;;  %v561_v3 = vpop.xlane.xlu1 %560  ;;  %v453_v32 = vpop.xlane.xlu2 %452  ;;  %1119 = vperm.xlu1 %1194, %v1041_v12   ;;  %vm701_vm11 = vweird.f32 %v1204_v6 }
 0x14e   :  { %v613_v41 = vmul.f32 0.0051020407, %v561_v3  ;;  %v1966_v16 = vmul.f32 0.0051020407, %v453_v32  ;;  %vm702_vm13 = vmor %vm700_vm12, %vm701_vm11 }
 0x14f   :  { %v693_v52 = vsel %vm692_vm10, %v1202_v7, %v689_v60  ;;  %v696_v56 = vmul.f32 %v1204_v6, %v695_v63 }
 0x150   :  { %v996_v50 = vmul.f32 %v964_v10, %v693_v52  ;;  %v997_v53 = vmul.f32 %v965_v61, %v693_v52  ;;  %v645_v27 = vsub.f32 %v613_v41, %v629_v0  ;;  %v630_v7 = vmul.f32 %v1966_v16, %v1966_v16 }
 0x151   :  { %v697_v57 = vmul.f32 0.5, %v696_v56 }
 0x152   :  { %v1124_v58 = vadd.f32 %v1836_v43, %v996_v50  ;;  %v1125_v51 = vadd.f32 %v1836_v43, %v997_v53  ;;  %v661_v62 = vadd.f32 0.001, %v645_v27  ;;  %v966_v43 = vmul.f32 %v1706_v13, %v854_v46 }
 0x153   :  { %v698_v44 = vsub.f32 1.5, %v697_v57  ;;  %v857_v53 = vsub.f32 %v1718_v25, %v1944_v17 }
 0x154   :  { %1156 = vst [vmem:[%s2256_s5 + $0x10] sm:$0xff] %v1124_v58  ;;  %1205 = vrsqrt.f32 %v661_v62  ;;  %vm710_vm15 = vweird.f32 %v661_v62 }
 0x155   :  { %1157 = vst.msk [vmem:[%s2256_s5 + $0x18] sm:$0xff] %vm433_vm4, %v1125_v51  ;;  %v699_v8 = vmul.f32 %v1204_v6, %v698_v44  ;;  %v565_v11 = vpop.xlane.xlu2 %564  ;;  %v969_v25 = vmul.f32 %v1722_v31, %v857_v53 }
 0x156   :  { %v614_v18 = vmul.f32 0.0051020407, %v565_v11 }
 0x157   :  { %v703_v12 = vsel %vm702_vm13, %v1204_v6, %v699_v8  ;;  %v569_v59 = vpop.xlane.xlu0 %568 }
 0x158   :  { %v998_v60 = vmul.f32 %v966_v43, %v703_v12  ;;  %v999_v63 = vmul.f32 %v967_v55, %v703_v12  ;;  %v646_v3 = vsub.f32 %v614_v18, %v630_v7  ;;  %v615_v27 = vmul.f32 0.0051020407, %v569_v59 }
 0x15a   :  { %v1206_v32 = vpop.eup %1205  ;;  %v1126_v10 = vadd.f32 %v1856_v20, %v998_v60  ;;  %v1127_v35 = vadd.f32 %v1856_v20, %v999_v63  ;;  %v662_v61 = vadd.f32 0.001, %v646_v3  ;;  %v856_v20 = vsub.f32 %v1716_v24, %v1944_v17 }
 0x15b   :  { %v705_v0 = vmul.f32 %v1206_v32, %v661_v62  ;;  %vm711_vm14 = vweird.f32 %v1206_v32  ;;  %v858_v62 = vsub.f32 %v1729_v37, %v1966_v16 }
 0x15c   :  { %1158 = vst [vmem:[%s2256_s5 + $0x20] sm:$0xff] %v1126_v10  ;;  %1207 = vrsqrt.f32 %v662_v61  ;;  %v968_v43 = vmul.f32 %v1722_v31, %v856_v20  ;;  %vm712_vm0 = vmor %vm710_vm15, %vm711_vm14  ;;  %vm720_vm2 = vweird.f32 %v662_v61 }
 0x15d   :  { %1159 = vst.msk [vmem:[%s2256_s5 + $0x28] sm:$0xff] %vm433_vm4, %v1127_v35  ;;  %v706_v13 = vmul.f32 %v1206_v32, %v705_v0  ;;  %v457_v6 = vpop.xlane.xlu2 %456 }
 0x15e   :  { %v1988_v41 = vmul.f32 0.0051020407, %v457_v6 }
 0x15f   :  { %v707_v52 = vmul.f32 0.5, %v706_v13  ;;  %v573_v56 = vpop.xlane.xlu1 %572  ;;  %v461_v50 = vpop.xlane.xlu0 %460 }
 0x160   :  { %v631_v46 = vmul.f32 %v1988_v41, %v1988_v41  ;;  %v1996_v57 = vmul.f32 0.0051020407, %v461_v50  ;;  %v616_v11 = vmul.f32 0.0051020407, %v573_v56 }
 0x161   :  { %v708_v40 = vsub.f32 1.5, %v707_v52 }
 0x162   :  { %v1208_v58 = vpop.eup %1207  ;;  %v647_v51 = vsub.f32 %v615_v27, %v631_v46  ;;  %v632_v24 = vmul.f32 %v1996_v57, %v1996_v57 }
 0x163   :  { %v709_v44 = vmul.f32 %v1206_v32, %v708_v40  ;;  %v715_v8 = vmul.f32 %v1208_v58, %v662_v61  ;;  %vm721_vm1 = vweird.f32 %v1208_v58 }
 0x164   :  { %v663_v17 = vadd.f32 0.001, %v647_v51  ;;  %v648_v18 = vsub.f32 %v616_v11, %v632_v24  ;;  %vm722_vm3 = vmor %vm720_vm2, %vm721_vm1  ;;  %v860_v24 = vsub.f32 %v1743_v48, %v1988_v41 }
 0x165   :  { %v713_v55 = vsel %vm712_vm0, %v1206_v32, %v709_v44  ;;  %v716_v7 = vmul.f32 %v1208_v58, %v715_v8  ;;  %v859_v32 = vsub.f32 %v1733_v39, %v1966_v16  ;;  %v970_v16 = vmul.f32 %v1741_v47, %v858_v62 }
 0x166   :  { %v1000_v12 = vmul.f32 %v968_v43, %v713_v55  ;;  %v1001_v59 = vmul.f32 %v969_v25, %v713_v55  ;;  %1209 = vrsqrt.f32 %v663_v17  ;;  %v2004_v63 = vadd.f32 0.001, %v648_v18 }
 0x167   :  { %v717_v60 = vmul.f32 0.5, %v716_v7  ;;  %v577_v3 = vpop.xlane.xlu2 %576  ;;  %v465_v10 = vpop.xlane.xlu1 %464  ;;  %v971_v52 = vmul.f32 %v1741_v47, %v859_v32  ;;  %vm730_vm6 = vweird.f32 %v663_v17 }
 0x168   :  { %v1128_v35 = vadd.f32 %v1834_v42, %v1000_v12  ;;  %v1129_v31 = vadd.f32 %v1834_v42, %v1001_v59  ;;  %v2010_v0 = vmul.f32 0.0051020407, %v465_v10  ;;  %1211 = vrsqrt.f32 %v2004_v63 }
 0x169   :  { %v718_v13 = vsub.f32 1.5, %v717_v60  ;;  %v617_v37 = vmul.f32 0.0051020407, %v577_v3  ;;  %vm740_vm9 = vweird.f32 %v2004_v63 }
 0x16a   :  { %1160 = vst [vmem:[%s2256_s5 + $0x30] sm:$0xff] %v1128_v35  ;;  %v633_v6 = vmul.f32 %v2010_v0, %v2010_v0 }
 0x16b   :  { %1161 = vst.msk [vmem:[%s2256_s5 + $0x38] sm:$0xff] %vm433_vm4, %v1129_v31  ;;  %v719_v39 = vmul.f32 %v1208_v58, %v718_v13 }
 0x16c   :  { %v1210_v42 = vpop.eup %1209  ;;  %v649_v56 = vsub.f32 %v617_v37, %v633_v6 }
 0x16d   :  { %v723_v50 = vsel %vm722_vm3, %v1208_v58, %v719_v39  ;;  %v725_v20 = vmul.f32 %v1210_v42, %v663_v17  ;;  %v861_v58 = vsub.f32 %v1751_v28, %v1988_v41  ;;  %vm731_vm5 = vweird.f32 %v1210_v42 }
 0x16e   :  { %v1002_v53 = vmul.f32 %v970_v16, %v723_v50  ;;  %v1003_v27 = vmul.f32 %v971_v52, %v723_v50  ;;  %v2024_v46 = vadd.f32 0.001, %v649_v56  ;;  %v1212_v40 = vpop.eup %1211  ;;  %v862_v28 = vsub.f32 %v1759_v1, %v1996_v57  ;;  %vm732_vm7 = vmor %vm730_vm6, %vm731_vm5 }
 0x16f   :  { %v726_v51 = vmul.f32 %v1210_v42, %v725_v20  ;;  %v581_v44 = vpop.xlane.xlu0 %580  ;;  %v469_v8 = vpop.xlane.xlu2 %468  ;;  %v735_v47 = vmul.f32 %v1212_v40, %v2004_v63  ;;  %v863_v41 = vsub.f32 %v1763_v5, %v1996_v57  ;;  %v973_v62 = vmul.f32 %v1725_v33, %v861_v58 }
 0x170   :  { %v1130_v11 = vadd.f32 %v1860_v23, %v1002_v53  ;;  %v1131_v61 = vadd.f32 %v1860_v23, %v1003_v27  ;;  %1213 = vrsqrt.f32 %v2024_v46  ;;  %v2037_v55 = vmul.f32 0.0051020407, %v469_v8 }
 0x171   :  { %v727_v43 = vmul.f32 0.5, %v726_v51  ;;  %v736_v25 = vmul.f32 %v1212_v40, %v735_v47  ;;  %v972_v23 = vmul.f32 %v1725_v33, %v860_v24  ;;  %v618_v18 = vmul.f32 0.0051020407, %v581_v44 }
 0x172   :  { %1162 = vst [vmem:[%s2256_s5 + $0x40] sm:$0xff] %v1130_v11  ;;  %v634_v12 = vmul.f32 %v2037_v55, %v2037_v55  ;;  %vm741_vm8 = vweird.f32 %v1212_v40  ;;  %v974_v5 = vmul.f32 %v1761_v4, %v862_v28  ;;  %v975_v57 = vmul.f32 %v1761_v4, %v863_v41 }
 0x173   :  { %1163 = vst.msk [vmem:[%s2256_s5 + $0x48] sm:$0xff] %vm433_vm4, %v1131_v61  ;;  %v728_v48 = vsub.f32 1.5, %v727_v43  ;;  %v737_v7 = vmul.f32 0.5, %v736_v25  ;;  %vm742_vm10 = vmor %vm740_vm9, %vm741_vm8  ;;  %v864_v27 = vsub.f32 %v1780_v22, %v2010_v0  ;;  %vm750_vm12 = vweird.f32 %v2024_v46 }
 0x174   :  { %v650_v3 = vsub.f32 %v618_v18, %v634_v12  ;;  %v867_v28 = vsub.f32 %v1800_v54, %v2037_v55 }
 0x175   :  { %v729_v59 = vmul.f32 %v1210_v42, %v728_v48  ;;  %v738_v60 = vsub.f32 1.5, %v737_v7 }
 0x176   :  { %v1214_v10 = vpop.eup %1213  ;;  %v666_v33 = vadd.f32 0.001, %v650_v3 }
 0x177   :  { %v733_v35 = vsel %vm732_vm7, %v1210_v42, %v729_v59  ;;  %v585_v31 = vpop.xlane.xlu1 %584  ;;  %v473_v32 = vpop.xlane.xlu0 %472  ;;  %v739_v37 = vmul.f32 %v1212_v40, %v738_v60  ;;  %v745_v1 = vmul.f32 %v1214_v10, %v2024_v46  ;;  %vm751_vm11 = vweird.f32 %v1214_v10 }
 0x178   :  { %v1004_v13 = vmul.f32 %v972_v23, %v733_v35  ;;  %v1005_v17 = vmul.f32 %v973_v62, %v733_v35  ;;  %v2055_v6 = vmul.f32 0.0051020407, %v473_v32  ;;  %1215 = vrsqrt.f32 %v666_v33  ;;  %vm752_vm13 = vmor %vm750_vm12, %vm751_vm11 }
 0x179   :  { %v743_v63 = vsel %vm742_vm10, %v1212_v40, %v739_v37  ;;  %v746_v16 = vmul.f32 %v1214_v10, %v745_v1  ;;  %v619_v20 = vmul.f32 0.0051020407, %v585_v31  ;;  %v865_v40 = vsub.f32 %v1782_v29, %v2010_v0 }
 0x17a   :  { %v1132_v39 = vadd.f32 %v1875_v14, %v1004_v13  ;;  %v1133_v42 = vadd.f32 %v1875_v14, %v1005_v17  ;;  %v1006_v52 = vmul.f32 %v974_v5, %v743_v63  ;;  %v1007_v56 = vmul.f32 %v975_v57, %v743_v63 }
 0x17b   :  { %v747_v50 = vmul.f32 0.5, %v746_v16  ;;  %v635_v4 = vmul.f32 %v2055_v6, %v2055_v6  ;;  %v976_v29 = vmul.f32 %v1745_v49, %v864_v27  ;;  %v977_v0 = vmul.f32 %v1745_v49, %v865_v40 }
 0x17c   :  { %1164 = vst [vmem:[%s2256_s5 + $0x50] sm:$0xff] %v1132_v39  ;;  %v1134_v14 = vadd.f32 %v1858_v21, %v1006_v52  ;;  %v1135_v53 = vadd.f32 %v1858_v21, %v1007_v56  ;;  %v866_v49 = vsub.f32 %v1798_v45, %v2037_v55  ;;  %vm760_vm15 = vweird.f32 %v666_v33 }
 0x17d   :  { %1165 = vst.msk [vmem:[%s2256_s5 + $0x58] sm:$0xff] %vm433_vm4, %v1133_v42  ;;  %v748_v51 = vsub.f32 1.5, %v747_v50  ;;  %v651_v44 = vsub.f32 %v619_v20, %v635_v4  ;;  %v979_v32 = vmul.f32 %v1769_v9, %v867_v28  ;;  %v868_v39 = vsub.f32 %v1812_v2, %v2055_v6 }
 0x17e   :  { %1166 = vst [vmem:[%s2256_s5 + $0x60] sm:$0xff] %v1134_v14  ;;  %v1216_v61 = vpop.eup %1215  ;;  %v978_v31 = vmul.f32 %v1769_v9, %v866_v49  ;;  %v2296_v49 = vld [vmem:[#allocation8_spill] sm:$0xff] }
 0x17f   :  { %v589_v8 = vpop.xlane.xlu2 %588  ;;  %v477_v11 = vpop.xlane.xlu1 %476  ;;  %1167 = vst.msk [vmem:[%s2256_s5 + $0x68] sm:$0xff] %vm433_vm4, %v1135_v53  ;;  %v749_v21 = vmul.f32 %v1214_v10, %v748_v51  ;;  %v667_v22 = vadd.f32 0.001, %v651_v44  ;;  %v755_v43 = vmul.f32 %v1216_v61, %v666_v33  ;;  %vm761_vm14 = vweird.f32 %v1216_v61 }
 0x180   :  { %v2084_v24 = vmul.f32 0.0051020407, %v477_v11  ;;  %v620_v48 = vmul.f32 0.0051020407, %v589_v8  ;;  %vm762_vm0 = vmor %vm760_vm15, %vm761_vm14  ;;  %v869_v33 = vsub.f32 %v1818_v15, %v2055_v6 }
 0x181   :  { %v753_v47 = vsel %vm752_vm13, %v1214_v10, %v749_v21  ;;  %1217 = vrsqrt.f32 %v667_v22  ;;  %v756_v7 = vmul.f32 %v1216_v61, %v755_v43  ;;  %vm770_vm2 = vweird.f32 %v667_v22 }
 0x182   :  { %v1008_v58 = vmul.f32 %v976_v29, %v753_v47  ;;  %v1009_v25 = vmul.f32 %v977_v0, %v753_v47  ;;  %v636_v23 = vmul.f32 %v2084_v24, %v2084_v24  ;;  %v981_v6 = vmul.f32 %v1790_v38, %v869_v33 }
 0x183   :  { %v757_v59 = vmul.f32 0.5, %v756_v7  ;;  %v870_v8 = vsub.f32 %v1828_v30, %v2084_v24  ;;  %v871_v11 = vsub.f32 %v1832_v36, %v2084_v24 }
 0x184   :  { %v1136_v46 = vadd.f32 %v1882_v26, %v1008_v58  ;;  %v1137_v18 = vadd.f32 %v1882_v26, %v1009_v25  ;;  %v652_v12 = vsub.f32 %v620_v48, %v636_v23 }
 0x185   :  { %v758_v26 = vsub.f32 1.5, %v757_v59 }
 0x186   :  { %1168 = vst [vmem:[%s2256_s5 + $0x70] sm:$0xff] %v1136_v46  ;;  %v2097_v41 = vadd.f32 0.001, %v652_v12 }
 0x187   :  { %v593_v62 = vpop.xlane.xlu0 %592  ;;  %v481_v60 = vpop.xlane.xlu2 %480  ;;  %1169 = vst.msk [vmem:[%s2256_s5 + $0x78] sm:$0xff] %vm433_vm4, %v1137_v18  ;;  %v759_v45 = vmul.f32 %v1216_v61, %v758_v26 }
 0x188   :  { %v1218_v3 = vpop.eup %1217  ;;  %v2103_v10 = vmul.f32 0.0051020407, %v481_v60  ;;  %1219 = vrsqrt.f32 %v2097_v41  ;;  %v621_v54 = vmul.f32 0.0051020407, %v593_v62  ;;  %vm780_vm6 = vweird.f32 %v2097_v41 }
 0x189   :  { %v765_v35 = vmul.f32 %v1218_v3, %v667_v22  ;;  %v763_v17 = vsel %vm762_vm0, %v1216_v61, %v759_v45  ;;  %vm771_vm1 = vweird.f32 %v1218_v3 }
 0x18a   :  { %v637_v55 = vmul.f32 %v2103_v10, %v2103_v10  ;;  %v1010_v1 = vmul.f32 %v978_v31, %v763_v17  ;;  %v1011_v5 = vmul.f32 %v979_v32, %v763_v17  ;;  %vm772_vm3 = vmor %vm770_vm2, %vm771_vm1  ;;  %v872_v28 = vsub.f32 %v2296_v49, %v2103_v10 }
 0x18b   :  { %v766_v13 = vmul.f32 %v1218_v3, %v765_v35 }
 0x18c   :  { %v653_v37 = vsub.f32 %v621_v54, %v637_v55  ;;  %v1138_v16 = vadd.f32 %v1896_v34, %v1010_v1  ;;  %v1139_v52 = vadd.f32 %v1896_v34, %v1011_v5  ;;  %v980_v34 = vmul.f32 %v1790_v38, %v868_v39 }
 0x18d   :  { %v767_v57 = vmul.f32 0.5, %v766_v13 }
 0x18e   :  { %v2114_v42 = vadd.f32 0.001, %v653_v37  ;;  %v1220_v63 = vpop.eup %1219  ;;  %1170 = vst [vmem:[%s2256_s5 + $0x80] sm:$0xff] %v1138_v16 }
 0x18f   :  { %v768_v9 = vsub.f32 1.5, %v767_v57  ;;  %v597_v56 = vpop.xlane.xlu1 %596  ;;  %v485_v50 = vpop.xlane.xlu0 %484  ;;  %v775_v20 = vmul.f32 %v1220_v63, %v2097_v41  ;;  %1171 = vst.msk [vmem:[%s2256_s5 + $0x88] sm:$0xff] %vm433_vm4, %v1139_v52  ;;  %vm781_vm5 = vweird.f32 %v1220_v63  ;;  %v2297_v41 = vld [vmem:[#allocation9_spill] sm:$0xff]  ;;  %v2300_v52 = vld [vmem:[#allocation20_spill] sm:$0xff] }
 0x190   :  { %1221 = vrsqrt.f32 %v2114_v42  ;;  %v2123_v15 = vmul.f32 0.0051020407, %v485_v50  ;;  %v622_v53 = vmul.f32 0.0051020407, %v597_v56  ;;  %vm782_vm7 = vmor %vm780_vm6, %vm781_vm5  ;;  %v873_v62 = vsub.f32 %v2297_v41, %v2103_v10  ;;  %v2299_v10 = vld [vmem:[#allocation4_spill] sm:$0xff] }
 0x191   :  { %v769_v2 = vmul.f32 %v1218_v3, %v768_v9  ;;  %v776_v4 = vmul.f32 %v1220_v63, %v775_v20  ;;  %vm790_vm9 = vweird.f32 %v2114_v42  ;;  %v984_v17 = vmul.f32 %v2299_v10, %v872_v28  ;;  %v2301_v20 = vld [vmem:[#allocation10_spill] sm:$0xff]  ;;  %v2306_v28 = vld [vmem:[#allocation13_spill] sm:$0xff] }
 0x192   :  { %v638_v27 = vmul.f32 %v2123_v15, %v2123_v15  ;;  %v985_v37 = vmul.f32 %v2299_v10, %v873_v62 }
 0x193   :  { %v773_v14 = vsel %vm772_vm3, %v1218_v3, %v769_v2  ;;  %v777_v44 = vmul.f32 0.5, %v776_v4  ;;  %v2298_v3 = vld [vmem:[#allocation15_spill] sm:$0xff]  ;;  %v874_v2 = vsub.f32 %v2301_v20, %v2123_v15 }
 0x194   :  { %v1012_v40 = vmul.f32 %v980_v34, %v773_v14  ;;  %v1013_v51 = vmul.f32 %v981_v6, %v773_v14  ;;  %v654_v21 = vsub.f32 %v622_v53, %v638_v27  ;;  %v2302_v34 = vld [vmem:[#allocation11_spill] sm:$0xff] }
 0x195   :  { %v778_v29 = vsub.f32 1.5, %v777_v44  ;;  %v875_v6 = vsub.f32 %v2302_v34, %v2123_v15  ;;  %v2303_v15 = vld [vmem:[#allocation5_spill] sm:$0xff] }
 0x196   :  { %v1222_v22 = vpop.eup %1221  ;;  %v1140_v61 = vadd.f32 %v1880_v19, %v1012_v40  ;;  %v1141_v38 = vadd.f32 %v1880_v19, %v1013_v51  ;;  %v2140_v47 = vadd.f32 0.001, %v654_v21  ;;  %v2295_v19 = vld [vmem:[#allocation2_spill] sm:$0xff] }
 0x197   :  { %v785_v0 = vmul.f32 %v1222_v22, %v2114_v42  ;;  %v601_v43 = vpop.xlane.xlu2 %600  ;;  %v489_v58 = vpop.xlane.xlu1 %488  ;;  %v779_v30 = vmul.f32 %v1220_v63, %v778_v29  ;;  %v982_v24 = vmul.f32 %v2295_v19, %v870_v8  ;;  %v983_v25 = vmul.f32 %v2295_v19, %v871_v11 }
 0x198   :  { %1172 = vst [vmem:[%s2256_s5 + $0x90] sm:$0xff] %v1140_v61  ;;  %v2146_v36 = vmul.f32 0.0051020407, %v489_v58  ;;  %1223 = vrsqrt.f32 %v2140_v47  ;;  %v623_v7 = vmul.f32 0.0051020407, %v601_v43  ;;  %vm791_vm8 = vweird.f32 %v1222_v22 }
 0x199   :  { %1173 = vst.msk [vmem:[%s2256_s5 + $0x98] sm:$0xff] %vm433_vm4, %v1141_v38  ;;  %v786_v48 = vmul.f32 %v1222_v22, %v785_v0  ;;  %v783_v23 = vsel %vm782_vm7, %v1220_v63, %v779_v30  ;;  %vm792_vm10 = vmor %vm790_vm9, %vm791_vm8  ;;  %vm800_vm12 = vweird.f32 %v2140_v47  ;;  %v986_v8 = vmul.f32 %v2303_v15, %v874_v2  ;;  %v2312_v2 = vld [vmem:[#allocation19_spill] sm:$0xff] }
 0x19a   :  { %v639_v46 = vmul.f32 %v2146_v36, %v2146_v36  ;;  %v1014_v18 = vmul.f32 %v982_v24, %v783_v23  ;;  %v1015_v12 = vmul.f32 %v983_v25, %v783_v23  ;;  %v877_v41 = vsub.f32 %v2306_v28, %v2146_v36 }
 0x19b   :  { %v787_v59 = vmul.f32 0.5, %v786_v48 }
 0x19c   :  { %v655_v60 = vsub.f32 %v623_v7, %v639_v46  ;;  %v1142_v26 = vadd.f32 %v2298_v3, %v1014_v18  ;;  %v1143_v35 = vadd.f32 %v2298_v3, %v1015_v12 }
 0x19d   :  { %v788_v45 = vsub.f32 1.5, %v787_v59  ;;  %v2305_v59 = vld [vmem:[#allocation12_spill] sm:$0xff] }
 0x19e   :  { %v2163_v54 = vadd.f32 0.001, %v655_v60  ;;  %v1224_v55 = vpop.eup %1223  ;;  %1174 = vst [vmem:[%s2256_s5 + $0xa0] sm:$0xff] %v1142_v26  ;;  %v876_v49 = vsub.f32 %v2305_v59, %v2146_v36  ;;  %v2307_v60 = vld [vmem:[#allocation14_spill] sm:$0xff]  ;;  %v2308_v26 = vld [vmem:[#allocation16_spill] sm:$0xff] }
 0x19f   :  { %v789_v31 = vmul.f32 %v1222_v22, %v788_v45  ;;  %v605_v32 = vpop.xlane.xlu0 %604  ;;  %v493_v13 = vpop.xlane.xlu2 %492  ;;  %1175 = vst.msk [vmem:[%s2256_s5 + $0xa8] sm:$0xff] %vm433_vm4, %v1143_v35  ;;  %v795_v1 = vmul.f32 %v1224_v55, %v2140_v47  ;;  %vm801_vm11 = vweird.f32 %v1224_v55  ;;  %v2304_v47 = vld [vmem:[#allocation17_spill] sm:$0xff] }
 0x1a0   :  { %1225 = vrsqrt.f32 %v2163_v54  ;;  %v2177_v57 = vmul.f32 0.0051020407, %v493_v13  ;;  %v624_v63 = vmul.f32 0.0051020407, %v605_v32  ;;  %vm802_vm13 = vmor %vm800_vm12, %vm801_vm11  ;;  %vm810_vm15 = vweird.f32 %v2163_v54  ;;  %v2309_v13 = vld [vmem:[#allocation3_spill] sm:$0xff] }
 0x1a1   :  { %v793_v5 = vsel %vm792_vm10, %v1222_v22, %v789_v31  ;;  %v796_v42 = vmul.f32 %v1224_v55, %v795_v1  ;;  %v987_v22 = vmul.f32 %v2303_v15, %v875_v6  ;;  %v988_v10 = vmul.f32 %v2309_v13, %v876_v49 }
 0x1a2   :  { %v1016_v39 = vmul.f32 %v984_v17, %v793_v5  ;;  %v1017_v33 = vmul.f32 %v985_v37, %v793_v5  ;;  %v640_v16 = vmul.f32 %v2177_v57, %v2177_v57  ;;  %v878_v3 = vsub.f32 %v2307_v60, %v2177_v57 }
 0x1a3   :  { %v797_v50 = vmul.f32 0.5, %v796_v42  ;;  %v879_v35 = vsub.f32 %v2308_v26, %v2177_v57  ;;  %v989_v36 = vmul.f32 %v2309_v13, %v877_v41 }
 0x1a4   :  { %v1144_v9 = vadd.f32 %v2300_v52, %v1016_v39  ;;  %v1145_v56 = vadd.f32 %v2300_v52, %v1017_v33  ;;  %v656_v4 = vsub.f32 %v624_v63, %v640_v16 }
 0x1a5   :  { %v798_v53 = vsub.f32 1.5, %v797_v50  ;;  %v2311_v50 = vld [vmem:[#allocation18_spill] sm:$0xff] }
 0x1a6   :  { %v1226_v14 = vpop.eup %1225  ;;  %1176 = vst [vmem:[%s2256_s5 + $0xb0] sm:$0xff] %v1144_v9  ;;  %v672_v40 = vadd.f32 0.001, %v656_v4 }
 0x1a7   :  { %1177 = vst.msk [vmem:[%s2256_s5 + $0xb8] sm:$0xff] %vm433_vm4, %v1145_v56  ;;  %v805_v27 = vmul.f32 %v1226_v14, %v2163_v54  ;;  %v497_v51 = vpop.xlane.xlu0 %496  ;;  %v799_v44 = vmul.f32 %v1224_v55, %v798_v53  ;;  %v609_v21 = vpop.xlane.xlu1 %608  ;;  %vm811_vm14 = vweird.f32 %v1226_v14  ;;  %v2310_v54 = vld [vmem:[#allocation6_spill] sm:$0xff] }
 0x1a8   :  { %v2197_v11 = vmul.f32 0.0051020407, %v497_v51  ;;  %1227 = vrsqrt.f32 %v672_v40  ;;  %v625_v61 = vmul.f32 0.0051020407, %v609_v21  ;;  %vm812_vm0 = vmor %vm810_vm15, %vm811_vm14  ;;  %vm820_vm2 = vweird.f32 %v672_v40  ;;  %v1115_v56 = vpop.permute.xlu2 %1114 }
 0x1a9   :  { %v806_v38 = vmul.f32 %v1226_v14, %v805_v27  ;;  %v803_v29 = vsel %vm802_vm13, %v1224_v55, %v799_v44  ;;  %v990_v37 = vmul.f32 %v2310_v54, %v878_v3  ;;  %v991_v1 = vmul.f32 %v2310_v54, %v879_v35 }
 0x1aa   :  { %v641_v0 = vmul.f32 %v2197_v11, %v2197_v11  ;;  %v1018_v43 = vmul.f32 %v986_v8, %v803_v29  ;;  %v1019_v58 = vmul.f32 %v987_v22, %v803_v29  ;;  %v880_v20 = vsub.f32 %v2311_v50, %v2197_v11 }
 0x1ab   :  { %v807_v30 = vmul.f32 0.5, %v806_v38  ;;  %v881_v34 = vsub.f32 %v2312_v2, %v2197_v11 }
 0x1ac   :  { %v657_v19 = vsub.f32 %v625_v61, %v641_v0  ;;  %v1146_v24 = vadd.f32 %v2304_v47, %v1018_v43  ;;  %v1147_v25 = vadd.f32 %v2304_v47, %v1019_v58 }
 0x1ad   :  { %v808_v23 = vsub.f32 1.5, %v807_v30 }
 0x1ae   :  { %v673_v48 = vadd.f32 0.001, %v657_v19  ;;  %v1228_v7 = vpop.eup %1227  ;;  %1178 = vst [vmem:[%s2256_s5 + $0xc0] sm:$0xff] %v1146_v24 }
 0x1af   :  { %1179 = vst.msk [vmem:[%s2256_s5 + $0xc8] sm:$0xff] %vm433_vm4, %v1147_v25  ;;  %v815_v46 = vmul.f32 %v1228_v7, %v672_v40  ;;  %v809_v12 = vmul.f32 %v1226_v14, %v808_v23  ;;  %vm821_vm1 = vweird.f32 %v1228_v7  ;;  %v2313_v40 = vld [vmem:[#allocation7_spill] sm:$0xff] }
 0x1b0   :  { %1229 = vrsqrt.f32 %v673_v48  ;;  %vm822_vm3 = vmor %vm820_vm2, %vm821_vm1  ;;  %vm830_vm6 = vweird.f32 %v673_v48  ;;  %v992_v51 = vmul.f32 %v2313_v40, %v880_v20  ;;  %v993_v44 = vmul.f32 %v2313_v40, %v881_v34 }
 0x1b1   :  { %v816_v18 = vmul.f32 %v1228_v7, %v815_v46  ;;  %v813_v31 = vsel %vm812_vm0, %v1226_v14, %v809_v12 }
 0x1b2   :  { %v1020_v39 = vmul.f32 %v988_v10, %v813_v31  ;;  %v1021_v33 = vmul.f32 %v989_v36, %v813_v31 }
 0x1b3   :  { %v817_v62 = vmul.f32 0.5, %v816_v18 }
 0x1b5   :  { %v818_v55 = vsub.f32 1.5, %v817_v62 }
 0x1b6   :  { %v1230_v45 = vpop.eup %1229 }
 0x1b7   :  { %v825_v32 = vmul.f32 %v1230_v45, %v673_v48  ;;  %v819_v17 = vmul.f32 %v1228_v7, %v818_v55  ;;  %vm831_vm5 = vweird.f32 %v1230_v45 }
 0x1b8   :  { %vm832_vm7 = vmor %vm830_vm6, %vm831_vm5 }
 0x1b9   :  { %v826_v5 = vmul.f32 %v1230_v45, %v825_v32  ;;  %v823_v57 = vsel %vm822_vm3, %v1228_v7, %v819_v17 }
 0x1ba   :  { %v1110_v42 = vpop.permute.xlu0 %1109  ;;  %v1022_v63 = vmul.f32 %v990_v37, %v823_v57  ;;  %v1023_v16 = vmul.f32 %v991_v1, %v823_v57 }
 0x1bb   :  { %v827_v52 = vmul.f32 0.5, %v826_v5  ;;  %v1148_v9 = vadd.f32 %v1110_v42, %v1020_v39  ;;  %v1149_v6 = vadd.f32 %v1110_v42, %v1021_v33 }
 0x1bc   :  { %v1150_v4 = vadd.f32 %v1115_v56, %v1022_v63  ;;  %v1151_v14 = vadd.f32 %v1115_v56, %v1023_v16 }
 0x1bd   :  { %1180 = vst [vmem:[%s2256_s5 + $0xd0] sm:$0xff] %v1148_v9  ;;  %v828_v53 = vsub.f32 1.5, %v827_v52 }
 0x1be   :  { %1181 = vst.msk [vmem:[%s2256_s5 + $0xd8] sm:$0xff] %vm433_vm4, %v1149_v6 }
 0x1bf   :  { %1182 = vst [vmem:[%s2256_s5 + $0xe0] sm:$0xff] %v1150_v4  ;;  %v829_v27 = vmul.f32 %v1230_v45, %v828_v53  ;;  %v1120_v21 = vpop.permute.xlu1 %1119 }
 0x1c0   :  { %1183 = vst.msk [vmem:[%s2256_s5 + $0xe8] sm:$0xff] %vm433_vm4, %v1151_v14 }
 0x1c1   :  { %v833_v15 = vsel %vm832_vm7, %v1230_v45, %v829_v27 }
 0x1c2   :  { %v1024_v8 = vmul.f32 %v992_v51, %v833_v15  ;;  %v1025_v11 = vmul.f32 %v993_v44, %v833_v15 }
 0x1c4   :  { %v1152_v22 = vadd.f32 %v1120_v21, %v1024_v8  ;;  %v1153_v61 = vadd.f32 %v1120_v21, %v1025_v11 }
 0x1c6   :  { %1184 = vst [vmem:[%s2256_s5 + $0xf0] sm:$0xff] %v1152_v22 }
 0x1c7   :  { %1185 = vst.msk [vmem:[%s2256_s5 + $0xf8] sm:$0xff] %vm433_vm4, %v1153_v61 }

</bundles_post_ra>
